<compile_context>
chip_gen: v7x
topology: tpu7x:2x2x1
jax: 0.10.0
libtpu: 0.0.40
codegen_flags: <defaults>
</compile_context>

<pallas_src>
import jax
import jax.numpy as jnp
from jax.experimental import pallas as pl
from jax.experimental.pallas import tpu as pltpu

LANES = 128  # padded output-channel width -> lane-dense stores


def _round_up(x, m):
    return (x + m - 1) // m * m


# ----------------------------------------------------------------------------
# Pallas kernels
# ----------------------------------------------------------------------------
def _conv_relu_pool_kernel(p_ref, w_ref, b_ref, o_ref):
    """Fused conv(matmul) + bias + ReLU + 2x2/2 maxpool for one image.

    p_ref: (1, 4, R, Kp) bf16 -- im2col patches, rows pre-grouped by pooling tap
    w_ref: (Kp, 128) bf16     -- conv weights, OC zero-padded to 128 lanes
    b_ref: (1, 128) f32       -- bias, zero-padded
    o_ref: (1, R, 128) f32    -- pooled output (R = PH*PW), lane-dense
    """
    w = w_ref[...]
    b = b_ref[...]

    def tap(g):
        acc = jnp.dot(p_ref[0, g], w, preferred_element_type=jnp.float32)
        return jnp.maximum(acc + b, 0.0)            # bias + ReLU in f32

    # 2x2 max-pool == elementwise max over the 4 pooling taps (VPU, in vregs)
    o_ref[0] = jnp.maximum(jnp.maximum(tap(0), tap(1)),
                           jnp.maximum(tap(2), tap(3)))


def _fc_fused_kernel(x_ref, w1_ref, b1_ref, w2_ref, b2_ref, w3_ref, b3_ref, o_ref):
    """fc1+ReLU -> fc2+ReLU -> fc3 chained in one kernel (weights VMEM-resident)."""
    h = jnp.dot(x_ref[...], w1_ref[...], preferred_element_type=jnp.float32)
    h = jnp.maximum(h + b1_ref[...], 0.0)
    h = jnp.dot(h.astype(jnp.bfloat16), w2_ref[...], preferred_element_type=jnp.float32)
    h = jnp.maximum(h + b2_ref[...], 0.0)
    o = jnp.dot(h.astype(jnp.bfloat16), w3_ref[...], preferred_element_type=jnp.float32)
    o_ref[...] = o + b3_ref[...]


# ----------------------------------------------------------------------------
# Glue: im2col with rows pre-grouped by 2x2 pooling tap (plain JAX, outside Pallas)
# ----------------------------------------------------------------------------
def _im2col_pool_taps(x_nhwc, k):
    """x: (N,H,W,C) -> (N, 4, PH*PW, C*k*k), valid conv stride 1.

    Column order c*k*k + ki*k + kj matches torch's w.reshape(OC, C*k*k).
    Row group g = i*2+j holds conv-output positions (2*ph+i, 2*pw+j), so a
    max over the 4 groups implements the 2x2/2 maxpool of relu(conv).
    """
    n, h, w, c = x_nhwc.shape
    oh, ow = h - k + 1, w - k + 1
    assert oh % 2 == 0 and ow % 2 == 0
    ph, pw = oh // 2, ow // 2
    taps = [x_nhwc[:, ki:ki + oh, kj:kj + ow, :] for ki in range(k) for kj in range(k)]
    p = jnp.stack(taps, axis=-1)                       # (N, OH, OW, C, k*k)
    p = p.reshape(n, ph, 2, pw, 2, c, k * k)
    p = p.transpose(0, 2, 4, 1, 3, 5, 6)               # (N, i, j, PH, PW, C, k*k)
    return p.reshape(n, 4, ph * pw, c * k * k), (ph, pw)


def _pad2d(a, rows, cols):
    r, c = a.shape
    return jnp.pad(a, ((0, rows - r), (0, cols - c)))


def _prep_conv_params(w, b, kp):
    oc, c, k, _ = w.shape
    wm = w.reshape(oc, c * k * k).T.astype(jnp.float32)        # (K, OC), torch col order
    wm = _pad2d(wm, kp, LANES).astype(jnp.bfloat16)            # (Kp, 128), zero-padded
    bp = jnp.pad(b.astype(jnp.float32), (0, LANES - oc)).reshape(1, LANES)
    return wm, bp


def _prep_fc_params(w, b, kp):
    _, nout = w.shape
    wm = _pad2d(w.astype(jnp.float32), kp, LANES).astype(jnp.bfloat16)
    bp = jnp.pad(b.astype(jnp.float32), (0, LANES - nout)).reshape(1, LANES)
    return wm, bp


# ----------------------------------------------------------------------------
# Pallas wrappers
# ----------------------------------------------------------------------------
def conv_relu_pool_pallas(x_nhwc, w, b):
    """Fused valid conv(k, stride 1) + bias + ReLU + 2x2/2 maxpool.

    Returns (N, PH*PW, 128) f32 with channels 0..OC-1 valid, and (PH, PW, OC).
    """
    n = x_nhwc.shape[0]
    oc, c, k, _ = w.shape
    patches, (ph, pw) = _im2col_pool_taps(x_nhwc, k)           # (N, 4, R, K)
    kdim = c * k * k
    kp = _round_up(kdim, 8)                                    # aligned contraction dim
    patches = jnp.pad(patches, ((0, 0), (0, 0), (0, 0), (0, kp - kdim)))
    patches = patches.astype(jnp.bfloat16)
    wm, bp = _prep_conv_params(w, b, kp)
    r = ph * pw

    out = pl.pallas_call(
        _conv_relu_pool_kernel,
        out_shape=jax.ShapeDtypeStruct((n, r, LANES), jnp.float32),
        grid=(n,),
        in_specs=[
            pl.BlockSpec((1, 4, r, kp), lambda i: (i, 0, 0, 0)),
            pl.BlockSpec((kp, LANES), lambda i: (0, 0)),
            pl.BlockSpec((1, LANES), lambda i: (0, 0)),
        ],
        out_specs=pl.BlockSpec((1, r, LANES), lambda i: (i, 0, 0)),
        compiler_params=pltpu.CompilerParams(dimension_semantics=("parallel",)),
        cost_estimate=pl.CostEstimate(
            flops=2 * n * 4 * r * kp * LANES,
            transcendentals=0,
            bytes_accessed=patches.size * 2 + wm.size * 2 + n * r * LANES * 4,
        ),
    )(patches, wm, bp)
    return out, (ph, pw, oc)


def fc_fused_pallas(x, params):
    """relu(x@W1+b1) -> relu(@W2+b2) -> @W3+b3, single kernel, batch-tiled grid."""
    n, kdim = x.shape                                          # kdim = 400
    num_classes = params["fc3_b"].shape[0]
    w1, b1 = _prep_fc_params(params["fc1_w"], params["fc1_b"], kdim)
    w2, b2 = _prep_fc_params(params["fc2_w"], params["fc2_b"], LANES)
    w3, b3 = _prep_fc_params(params["fc3_w"], params["fc3_b"], LANES)
    bm = 256 if n % 256 == 0 else n                            # batch tile

    out = pl.pallas_call(
        _fc_fused_kernel,
        out_shape=jax.ShapeDtypeStruct((n, LANES), jnp.float32),
        grid=(n // bm,),
        in_specs=[
            pl.BlockSpec((bm, kdim), lambda i: (i, 0)),
            pl.BlockSpec((kdim, LANES), lambda i: (0, 0)),
            pl.BlockSpec((1, LANES), lambda i: (0, 0)),
            pl.BlockSpec((LANES, LANES), lambda i: (0, 0)),
            pl.BlockSpec((1, LANES), lambda i: (0, 0)),
            pl.BlockSpec((LANES, LANES), lambda i: (0, 0)),
            pl.BlockSpec((1, LANES), lambda i: (0, 0)),
        ],
        out_specs=pl.BlockSpec((bm, LANES), lambda i: (i, 0)),
        compiler_params=pltpu.CompilerParams(dimension_semantics=("parallel",)),
        cost_estimate=pl.CostEstimate(
            flops=2 * n * (kdim + LANES + LANES) * LANES,
            transcendentals=0,
            bytes_accessed=x.size * 2 + (w1.size + w2.size + w3.size) * 2 + n * LANES * 4,
        ),
    )(x.astype(jnp.bfloat16), w1, b1, w2, b2, w3, b3)
    return out[:, :num_classes]


# ----------------------------------------------------------------------------
# Model: deterministic parameter init (PyTorch-ish uniform(-1/sqrt(fan_in), ...))
# ----------------------------------------------------------------------------
def init_params(num_classes=10, seed=0):
    key = jax.random.PRNGKey(seed)
    ks = jax.random.split(key, 10)

    def u(k, shape, fan_in):
        bound = 1.0 / jnp.sqrt(fan_in)
        return jax.random.uniform(k, shape, jnp.float32, -bound, bound)

    return {
        "conv1_w": u(ks[0], (6, 3, 5, 5), 3 * 5 * 5),
        "conv1_b": u(ks[1], (6,), 3 * 5 * 5),
        "conv2_w": u(ks[2], (16, 6, 5, 5), 6 * 5 * 5),
        "conv2_b": u(ks[3], (16,), 6 * 5 * 5),
        "fc1_w": u(ks[4], (400, 120), 400),   # stored (in, out); rows in torch c*25+s order
        "fc1_b": u(ks[5], (120,), 400),
        "fc2_w": u(ks[6], (120, 84), 120),
        "fc2_b": u(ks[7], (84,), 120),
        "fc3_w": u(ks[8], (84, num_classes), 84),
        "fc3_b": u(ks[9], (num_classes,), 84),
    }


def cnn_cifar_forward(params, x):
    # x: (N, 3, 32, 32) NCHW, like PyTorch
    n = x.shape[0]
    xh = jnp.transpose(x.astype(jnp.float32), (0, 2, 3, 1))           # NHWC (N,32,32,3)

    y1, (ph1, pw1, oc1) = conv_relu_pool_pallas(xh, params["conv1_w"], params["conv1_b"])
    h1 = y1[:, :, :oc1].reshape(n, ph1, pw1, oc1)                     # (N,14,14,6)

    y2, (ph2, pw2, oc2) = conv_relu_pool_pallas(h1, params["conv2_w"], params["conv2_b"])
    z = y2[:, :, :oc2]                                                # (N,25,16)
    # match torch's x.view(-1, 16*5*5): flattened index = c*25 + (h*5 + w)
    z = jnp.transpose(z, (0, 2, 1)).reshape(n, oc2 * ph2 * pw2)       # (N,400)

    return fc_fused_pallas(z, params)


if __name__ == "__main__":
    num_classes = 10
    batch = 2
    key = jax.random.PRNGKey(0)
    x = jax.random.normal(key, (batch, 3, 32, 32), jnp.float32)   # CIFAR-shaped input

    params = init_params(num_classes=num_classes, seed=0)
    fwd = jax.jit(cnn_cifar_forward)
    out = jax.block_until_ready(fwd(params, x))
    assert out.shape == (batch, num_classes), out.shape
    assert bool(jnp.all(jnp.isfinite(out)))
    print("KERNEL_OK")
</pallas_src>

<mosaic_0001>
module attributes {stable_mosaic.version = 11 : i64} {
  func.func @_conv_relu_pool_kernel(%arg0: i32, %arg1: memref<1x4x196x80xbf16, #tpu.memory_space<vmem>>, %arg2: memref<80x128xbf16, #tpu.memory_space<vmem>>, %arg3: memref<1x128xf32, #tpu.memory_space<vmem>>, %arg4: memref<1x196x128xf32, #tpu.memory_space<vmem>>) attributes {dimension_semantics = [#tpu.dimension_semantics<parallel>], iteration_bounds = array<i64: 2>, scalar_prefetch = 0 : i64, scratch_operands = 0 : i64, tpu.core_type = #tpu.core_type<tc>, window_params = [{transform_indices = @transform_0, window_bounds = array<i64: 1, 4, 196, 80>}, {pipeline_mode = #tpu.pipeline_mode<synchronous>, transform_indices = @transform_1, window_bounds = array<i64: 80, 128>}, {pipeline_mode = #tpu.pipeline_mode<synchronous>, transform_indices = @transform_2, window_bounds = array<i64: 1, 128>}, {transform_indices = @transform_3, window_bounds = array<i64: 1, 196, 128>}]} {
    %c0 = arith.constant 0 : index
    %c0_0 = arith.constant 0 : index
    %0 = vector.load %arg2[%c0, %c0_0] : memref<80x128xbf16, #tpu.memory_space<vmem>>, vector<80x128xbf16>
    %c0_1 = arith.constant 0 : index
    %c0_2 = arith.constant 0 : index
    %1 = vector.load %arg3[%c0_1, %c0_2] : memref<1x128xf32, #tpu.memory_space<vmem>>, vector<1x128xf32>
    %c0_3 = arith.constant 0 : index
    %c0_4 = arith.constant 0 : index
    %c0_5 = arith.constant 0 : index
    %c0_6 = arith.constant 0 : index
    %2 = vector.load %arg1[%c0_3, %c0_4, %c0_5, %c0_6] : memref<1x4x196x80xbf16, #tpu.memory_space<vmem>>, vector<1x1x196x80xbf16>
    %3 = vector.shape_cast %2 : vector<1x1x196x80xbf16> to vector<196x80xbf16>
    %cst = arith.constant dense<0.000000e+00> : vector<196x128xf32>
    %4 = tpu.matmul %3, %0, %cst {dimension_numbers = #tpu.dot_dimension_numbers<[1], [0], [0], [1], [0, 0, 1, 1], [], []>} : vector<196x80xbf16>, vector<80x128xbf16>, vector<196x128xf32> -> vector<196x128xf32>
    %5 = vector.broadcast %1 : vector<1x128xf32> to vector<196x128xf32>
    %6 = arith.addf %4, %5 : vector<196x128xf32>
    %cst_7 = arith.constant 0.000000e+00 : f32
    %7 = vector.broadcast %cst_7 : f32 to vector<196x128xf32>
    %8 = arith.maximumf %6, %7 : vector<196x128xf32>
    %c0_8 = arith.constant 0 : index
    %c1 = arith.constant 1 : index
    %c0_9 = arith.constant 0 : index
    %c0_10 = arith.constant 0 : index
    %9 = vector.load %arg1[%c0_8, %c1, %c0_9, %c0_10] : memref<1x4x196x80xbf16, #tpu.memory_space<vmem>>, vector<1x1x196x80xbf16>
    %10 = vector.shape_cast %9 : vector<1x1x196x80xbf16> to vector<196x80xbf16>
    %cst_11 = arith.constant dense<0.000000e+00> : vector<196x128xf32>
    %11 = tpu.matmul %10, %0, %cst_11 {dimension_numbers = #tpu.dot_dimension_numbers<[1], [0], [0], [1], [0, 0, 1, 1], [], []>} : vector<196x80xbf16>, vector<80x128xbf16>, vector<196x128xf32> -> vector<196x128xf32>
    %12 = vector.broadcast %1 : vector<1x128xf32> to vector<196x128xf32>
    %13 = arith.addf %11, %12 : vector<196x128xf32>
    %cst_12 = arith.constant 0.000000e+00 : f32
    %14 = vector.broadcast %cst_12 : f32 to vector<196x128xf32>
    %15 = arith.maximumf %13, %14 : vector<196x128xf32>
    %16 = arith.maximumf %8, %15 : vector<196x128xf32>
    %c0_13 = arith.constant 0 : index
    %c2 = arith.constant 2 : index
    %c0_14 = arith.constant 0 : index
    %c0_15 = arith.constant 0 : index
    %17 = vector.load %arg1[%c0_13, %c2, %c0_14, %c0_15] : memref<1x4x196x80xbf16, #tpu.memory_space<vmem>>, vector<1x1x196x80xbf16>
    %18 = vector.shape_cast %17 : vector<1x1x196x80xbf16> to vector<196x80xbf16>
    %cst_16 = arith.constant dense<0.000000e+00> : vector<196x128xf32>
    %19 = tpu.matmul %18, %0, %cst_16 {dimension_numbers = #tpu.dot_dimension_numbers<[1], [0], [0], [1], [0, 0, 1, 1], [], []>} : vector<196x80xbf16>, vector<80x128xbf16>, vector<196x128xf32> -> vector<196x128xf32>
    %20 = vector.broadcast %1 : vector<1x128xf32> to vector<196x128xf32>
    %21 = arith.addf %19, %20 : vector<196x128xf32>
    %cst_17 = arith.constant 0.000000e+00 : f32
    %22 = vector.broadcast %cst_17 : f32 to vector<196x128xf32>
    %23 = arith.maximumf %21, %22 : vector<196x128xf32>
    %c0_18 = arith.constant 0 : index
    %c3 = arith.constant 3 : index
    %c0_19 = arith.constant 0 : index
    %c0_20 = arith.constant 0 : index
    %24 = vector.load %arg1[%c0_18, %c3, %c0_19, %c0_20] : memref<1x4x196x80xbf16, #tpu.memory_space<vmem>>, vector<1x1x196x80xbf16>
    %25 = vector.shape_cast %24 : vector<1x1x196x80xbf16> to vector<196x80xbf16>
    %cst_21 = arith.constant dense<0.000000e+00> : vector<196x128xf32>
    %26 = tpu.matmul %25, %0, %cst_21 {dimension_numbers = #tpu.dot_dimension_numbers<[1], [0], [0], [1], [0, 0, 1, 1], [], []>} : vector<196x80xbf16>, vector<80x128xbf16>, vector<196x128xf32> -> vector<196x128xf32>
    %27 = vector.broadcast %1 : vector<1x128xf32> to vector<196x128xf32>
    %28 = arith.addf %26, %27 : vector<196x128xf32>
    %cst_22 = arith.constant 0.000000e+00 : f32
    %29 = vector.broadcast %cst_22 : f32 to vector<196x128xf32>
    %30 = arith.maximumf %28, %29 : vector<196x128xf32>
    %31 = arith.maximumf %23, %30 : vector<196x128xf32>
    %32 = arith.maximumf %16, %31 : vector<196x128xf32>
    %c0_23 = arith.constant 0 : index
    %c0_24 = arith.constant 0 : index
    %c0_25 = arith.constant 0 : index
    %33 = vector.load %arg4[%c0_23, %c0_24, %c0_25] : memref<1x196x128xf32, #tpu.memory_space<vmem>>, vector<1x196x128xf32>
    %34 = vector.shape_cast %33 : vector<1x196x128xf32> to vector<196x128xf32>
    %35 = vector.shape_cast %32 : vector<196x128xf32> to vector<1x196x128xf32>
    tpu.vector_store %arg4[%c0_23, %c0_24, %c0_25], %35 {strides = array<i32>} : memref<1x196x128xf32, #tpu.memory_space<vmem>>, vector<1x196x128xf32>,
    return
  }
  func.func @transform_0(%arg0: i32) -> (i32, i32, i32, i32) {
    %c0_i32 = arith.constant 0 : i32
    %c0_i32_0 = arith.constant 0 : i32
    %c0_i32_1 = arith.constant 0 : i32
    %c0_i32_2 = arith.constant 0 : i32
    return %arg0, %c0_i32, %c0_i32_0, %c0_i32_1 : i32, i32, i32, i32
  }
  func.func @transform_1(%arg0: i32) -> (i32, i32) {
    %c0_i32 = arith.constant 0 : i32
    %c0_i32_0 = arith.constant 0 : i32
    %c0_i32_1 = arith.constant 0 : i32
    return %c0_i32, %c0_i32_0 : i32, i32
  }
  func.func @transform_2(%arg0: i32) -> (i32, i32) {
    %c0_i32 = arith.constant 0 : i32
    %c0_i32_0 = arith.constant 0 : i32
    %c0_i32_1 = arith.constant 0 : i32
    return %c0_i32, %c0_i32_0 : i32, i32
  }
  func.func @transform_3(%arg0: i32) -> (i32, i32, i32) {
    %c0_i32 = arith.constant 0 : i32
    %c0_i32_0 = arith.constant 0 : i32
    %c0_i32_1 = arith.constant 0 : i32
    return %arg0, %c0_i32, %c0_i32_0 : i32, i32, i32
  }
}

module attributes {stable_mosaic.version = 11 : i64} {
  func.func @_conv_relu_pool_kernel(%arg0: i32, %arg1: memref<1x4x25x152xbf16, #tpu.memory_space<vmem>>, %arg2: memref<152x128xbf16, #tpu.memory_space<vmem>>, %arg3: memref<1x128xf32, #tpu.memory_space<vmem>>, %arg4: memref<1x25x128xf32, #tpu.memory_space<vmem>>) attributes {dimension_semantics = [#tpu.dimension_semantics<parallel>], iteration_bounds = array<i64: 2>, scalar_prefetch = 0 : i64, scratch_operands = 0 : i64, tpu.core_type = #tpu.core_type<tc>, window_params = [{transform_indices = @transform_0, window_bounds = array<i64: 1, 4, 25, 152>}, {pipeline_mode = #tpu.pipeline_mode<synchronous>, transform_indices = @transform_1, window_bounds = array<i64: 152, 128>}, {pipeline_mode = #tpu.pipeline_mode<synchronous>, transform_indices = @transform_2, window_bounds = array<i64: 1, 128>}, {transform_indices = @transform_3, window_bounds = array<i64: 1, 25, 128>}]} {
    %c0 = arith.constant 0 : index
    %c0_0 = arith.constant 0 : index
    %0 = vector.load %arg2[%c0, %c0_0] : memref<152x128xbf16, #tpu.memory_space<vmem>>, vector<152x128xbf16>
    %c0_1 = arith.constant 0 : index
    %c0_2 = arith.constant 0 : index
    %1 = vector.load %arg3[%c0_1, %c0_2] : memref<1x128xf32, #tpu.memory_space<vmem>>, vector<1x128xf32>
    %c0_3 = arith.constant 0 : index
    %c0_4 = arith.constant 0 : index
    %c0_5 = arith.constant 0 : index
    %c0_6 = arith.constant 0 : index
    %2 = vector.load %arg1[%c0_3, %c0_4, %c0_5, %c0_6] : memref<1x4x25x152xbf16, #tpu.memory_space<vmem>>, vector<1x1x25x152xbf16>
    %3 = vector.shape_cast %2 : vector<1x1x25x152xbf16> to vector<25x152xbf16>
    %cst = arith.constant dense<0.000000e+00> : vector<25x128xf32>
    %4 = tpu.matmul %3, %0, %cst {dimension_numbers = #tpu.dot_dimension_numbers<[1], [0], [0], [1], [0, 0, 1, 1], [], []>} : vector<25x152xbf16>, vector<152x128xbf16>, vector<25x128xf32> -> vector<25x128xf32>
    %5 = vector.broadcast %1 : vector<1x128xf32> to vector<25x128xf32>
    %6 = arith.addf %4, %5 : vector<25x128xf32>
    %cst_7 = arith.constant 0.000000e+00 : f32
    %7 = vector.broadcast %cst_7 : f32 to vector<25x128xf32>
    %8 = arith.maximumf %6, %7 : vector<25x128xf32>
    %c0_8 = arith.constant 0 : index
    %c1 = arith.constant 1 : index
    %c0_9 = arith.constant 0 : index
    %c0_10 = arith.constant 0 : index
    %9 = vector.load %arg1[%c0_8, %c1, %c0_9, %c0_10] : memref<1x4x25x152xbf16, #tpu.memory_space<vmem>>, vector<1x1x25x152xbf16>
    %10 = vector.shape_cast %9 : vector<1x1x25x152xbf16> to vector<25x152xbf16>
    %cst_11 = arith.constant dense<0.000000e+00> : vector<25x128xf32>
    %11 = tpu.matmul %10, %0, %cst_11 {dimension_numbers = #tpu.dot_dimension_numbers<[1], [0], [0], [1], [0, 0, 1, 1], [], []>} : vector<25x152xbf16>, vector<152x128xbf16>, vector<25x128xf32> -> vector<25x128xf32>
    %12 = vector.broadcast %1 : vector<1x128xf32> to vector<25x128xf32>
    %13 = arith.addf %11, %12 : vector<25x128xf32>
    %cst_12 = arith.constant 0.000000e+00 : f32
    %14 = vector.broadcast %cst_12 : f32 to vector<25x128xf32>
    %15 = arith.maximumf %13, %14 : vector<25x128xf32>
    %16 = arith.maximumf %8, %15 : vector<25x128xf32>
    %c0_13 = arith.constant 0 : index
    %c2 = arith.constant 2 : index
    %c0_14 = arith.constant 0 : index
    %c0_15 = arith.constant 0 : index
    %17 = vector.load %arg1[%c0_13, %c2, %c0_14, %c0_15] : memref<1x4x25x152xbf16, #tpu.memory_space<vmem>>, vector<1x1x25x152xbf16>
    %18 = vector.shape_cast %17 : vector<1x1x25x152xbf16> to vector<25x152xbf16>
    %cst_16 = arith.constant dense<0.000000e+00> : vector<25x128xf32>
    %19 = tpu.matmul %18, %0, %cst_16 {dimension_numbers = #tpu.dot_dimension_numbers<[1], [0], [0], [1], [0, 0, 1, 1], [], []>} : vector<25x152xbf16>, vector<152x128xbf16>, vector<25x128xf32> -> vector<25x128xf32>
    %20 = vector.broadcast %1 : vector<1x128xf32> to vector<25x128xf32>
    %21 = arith.addf %19, %20 : vector<25x128xf32>
    %cst_17 = arith.constant 0.000000e+00 : f32
    %22 = vector.broadcast %cst_17 : f32 to vector<25x128xf32>
    %23 = arith.maximumf %21, %22 : vector<25x128xf32>
    %c0_18 = arith.constant 0 : index
    %c3 = arith.constant 3 : index
    %c0_19 = arith.constant 0 : index
    %c0_20 = arith.constant 0 : index
    %24 = vector.load %arg1[%c0_18, %c3, %c0_19, %c0_20] : memref<1x4x25x152xbf16, #tpu.memory_space<vmem>>, vector<1x1x25x152xbf16>
    %25 = vector.shape_cast %24 : vector<1x1x25x152xbf16> to vector<25x152xbf16>
    %cst_21 = arith.constant dense<0.000000e+00> : vector<25x128xf32>
    %26 = tpu.matmul %25, %0, %cst_21 {dimension_numbers = #tpu.dot_dimension_numbers<[1], [0], [0], [1], [0, 0, 1, 1], [], []>} : vector<25x152xbf16>, vector<152x128xbf16>, vector<25x128xf32> -> vector<25x128xf32>
    %27 = vector.broadcast %1 : vector<1x128xf32> to vector<25x128xf32>
    %28 = arith.addf %26, %27 : vector<25x128xf32>
    %cst_22 = arith.constant 0.000000e+00 : f32
    %29 = vector.broadcast %cst_22 : f32 to vector<25x128xf32>
    %30 = arith.maximumf %28, %29 : vector<25x128xf32>
    %31 = arith.maximumf %23, %30 : vector<25x128xf32>
    %32 = arith.maximumf %16, %31 : vector<25x128xf32>
    %c0_23 = arith.constant 0 : index
    %c0_24 = arith.constant 0 : index
    %c0_25 = arith.constant 0 : index
    %33 = vector.load %arg4[%c0_23, %c0_24, %c0_25] : memref<1x25x128xf32, #tpu.memory_space<vmem>>, vector<1x25x128xf32>
    %34 = vector.shape_cast %33 : vector<1x25x128xf32> to vector<25x128xf32>
    %35 = vector.shape_cast %32 : vector<25x128xf32> to vector<1x25x128xf32>
    tpu.vector_store %arg4[%c0_23, %c0_24, %c0_25], %35 {strides = array<i32>} : memref<1x25x128xf32, #tpu.memory_space<vmem>>, vector<1x25x128xf32>,
    return
  }
  func.func @transform_0(%arg0: i32) -> (i32, i32, i32, i32) {
    %c0_i32 = arith.constant 0 : i32
    %c0_i32_0 = arith.constant 0 : i32
    %c0_i32_1 = arith.constant 0 : i32
    %c0_i32_2 = arith.constant 0 : i32
    return %arg0, %c0_i32, %c0_i32_0, %c0_i32_1 : i32, i32, i32, i32
  }
  func.func @transform_1(%arg0: i32) -> (i32, i32) {
    %c0_i32 = arith.constant 0 : i32
    %c0_i32_0 = arith.constant 0 : i32
    %c0_i32_1 = arith.constant 0 : i32
    return %c0_i32, %c0_i32_0 : i32, i32
  }
  func.func @transform_2(%arg0: i32) -> (i32, i32) {
    %c0_i32 = arith.constant 0 : i32
    %c0_i32_0 = arith.constant 0 : i32
    %c0_i32_1 = arith.constant 0 : i32
    return %c0_i32, %c0_i32_0 : i32, i32
  }
  func.func @transform_3(%arg0: i32) -> (i32, i32, i32) {
    %c0_i32 = arith.constant 0 : i32
    %c0_i32_0 = arith.constant 0 : i32
    %c0_i32_1 = arith.constant 0 : i32
    return %arg0, %c0_i32, %c0_i32_0 : i32, i32, i32
  }
}

module attributes {stable_mosaic.version = 11 : i64} {
  func.func @_fc_fused_kernel(%arg0: i32, %arg1: memref<2x400xbf16, #tpu.memory_space<vmem>>, %arg2: memref<400x128xbf16, #tpu.memory_space<vmem>>, %arg3: memref<1x128xf32, #tpu.memory_space<vmem>>, %arg4: memref<128x128xbf16, #tpu.memory_space<vmem>>, %arg5: memref<1x128xf32, #tpu.memory_space<vmem>>, %arg6: memref<128x128xbf16, #tpu.memory_space<vmem>>, %arg7: memref<1x128xf32, #tpu.memory_space<vmem>>, %arg8: memref<2x128xf32, #tpu.memory_space<vmem>>) attributes {dimension_semantics = [#tpu.dimension_semantics<parallel>], iteration_bounds = array<i64: 1>, scalar_prefetch = 0 : i64, scratch_operands = 0 : i64, tpu.core_type = #tpu.core_type<tc>, window_params = [{transform_indices = @transform_0, window_bounds = array<i64: 2, 400>}, {pipeline_mode = #tpu.pipeline_mode<synchronous>, transform_indices = @transform_1, window_bounds = array<i64: 400, 128>}, {pipeline_mode = #tpu.pipeline_mode<synchronous>, transform_indices = @transform_2, window_bounds = array<i64: 1, 128>}, {pipeline_mode = #tpu.pipeline_mode<synchronous>, transform_indices = @transform_3, window_bounds = array<i64: 128, 128>}, {pipeline_mode = #tpu.pipeline_mode<synchronous>, transform_indices = @transform_4, window_bounds = array<i64: 1, 128>}, {pipeline_mode = #tpu.pipeline_mode<synchronous>, transform_indices = @transform_5, window_bounds = array<i64: 128, 128>}, {pipeline_mode = #tpu.pipeline_mode<synchronous>, transform_indices = @transform_6, window_bounds = array<i64: 1, 128>}, {transform_indices = @transform_7, window_bounds = array<i64: 2, 128>}]} {
    %c0 = arith.constant 0 : index
    %c0_0 = arith.constant 0 : index
    %0 = vector.load %arg1[%c0, %c0_0] : memref<2x400xbf16, #tpu.memory_space<vmem>>, vector<2x400xbf16>
    %c0_1 = arith.constant 0 : index
    %c0_2 = arith.constant 0 : index
    %1 = vector.load %arg2[%c0_1, %c0_2] : memref<400x128xbf16, #tpu.memory_space<vmem>>, vector<400x128xbf16>
    %cst = arith.constant dense<0.000000e+00> : vector<2x128xf32>
    %2 = tpu.matmul %0, %1, %cst {dimension_numbers = #tpu.dot_dimension_numbers<[1], [0], [0], [1], [0, 0, 1, 1], [], []>} : vector<2x400xbf16>, vector<400x128xbf16>, vector<2x128xf32> -> vector<2x128xf32>
    %c0_3 = arith.constant 0 : index
    %c0_4 = arith.constant 0 : index
    %3 = vector.load %arg3[%c0_3, %c0_4] : memref<1x128xf32, #tpu.memory_space<vmem>>, vector<1x128xf32>
    %4 = vector.broadcast %3 : vector<1x128xf32> to vector<2x128xf32>
    %5 = arith.addf %2, %4 : vector<2x128xf32>
    %cst_5 = arith.constant 0.000000e+00 : f32
    %6 = vector.broadcast %cst_5 : f32 to vector<2x128xf32>
    %7 = arith.maximumf %5, %6 : vector<2x128xf32>
    %8 = arith.truncf %7 : vector<2x128xf32> to vector<2x128xbf16>
    %c0_6 = arith.constant 0 : index
    %c0_7 = arith.constant 0 : index
    %9 = vector.load %arg4[%c0_6, %c0_7] : memref<128x128xbf16, #tpu.memory_space<vmem>>, vector<128x128xbf16>
    %cst_8 = arith.constant dense<0.000000e+00> : vector<2x128xf32>
    %10 = tpu.matmul %8, %9, %cst_8 {dimension_numbers = #tpu.dot_dimension_numbers<[1], [0], [0], [1], [0, 0, 1, 1], [], []>} : vector<2x128xbf16>, vector<128x128xbf16>, vector<2x128xf32> -> vector<2x128xf32>
    %c0_9 = arith.constant 0 : index
    %c0_10 = arith.constant 0 : index
    %11 = vector.load %arg5[%c0_9, %c0_10] : memref<1x128xf32, #tpu.memory_space<vmem>>, vector<1x128xf32>
    %12 = vector.broadcast %11 : vector<1x128xf32> to vector<2x128xf32>
    %13 = arith.addf %10, %12 : vector<2x128xf32>
    %cst_11 = arith.constant 0.000000e+00 : f32
    %14 = vector.broadcast %cst_11 : f32 to vector<2x128xf32>
    %15 = arith.maximumf %13, %14 : vector<2x128xf32>
    %16 = arith.truncf %15 : vector<2x128xf32> to vector<2x128xbf16>
    %c0_12 = arith.constant 0 : index
    %c0_13 = arith.constant 0 : index
    %17 = vector.load %arg6[%c0_12, %c0_13] : memref<128x128xbf16, #tpu.memory_space<vmem>>, vector<128x128xbf16>
    %cst_14 = arith.constant dense<0.000000e+00> : vector<2x128xf32>
    %18 = tpu.matmul %16, %17, %cst_14 {dimension_numbers = #tpu.dot_dimension_numbers<[1], [0], [0], [1], [0, 0, 1, 1], [], []>} : vector<2x128xbf16>, vector<128x128xbf16>, vector<2x128xf32> -> vector<2x128xf32>
    %c0_15 = arith.constant 0 : index
    %c0_16 = arith.constant 0 : index
    %19 = vector.load %arg7[%c0_15, %c0_16] : memref<1x128xf32, #tpu.memory_space<vmem>>, vector<1x128xf32>
    %20 = vector.broadcast %19 : vector<1x128xf32> to vector<2x128xf32>
    %21 = arith.addf %18, %20 : vector<2x128xf32>
    %c0_17 = arith.constant 0 : index
    %c0_18 = arith.constant 0 : index
    %22 = vector.load %arg8[%c0_17, %c0_18] : memref<2x128xf32, #tpu.memory_space<vmem>>, vector<2x128xf32>
    tpu.vector_store %arg8[%c0_17, %c0_18], %21 {strides = array<i32>} : memref<2x128xf32, #tpu.memory_space<vmem>>, vector<2x128xf32>,
    return
  }
  func.func @transform_0(%arg0: i32) -> (i32, i32) {
    %c0_i32 = arith.constant 0 : i32
    %c0_i32_0 = arith.constant 0 : i32
    return %arg0, %c0_i32 : i32, i32
  }
  func.func @transform_1(%arg0: i32) -> (i32, i32) {
    %c0_i32 = arith.constant 0 : i32
    %c0_i32_0 = arith.constant 0 : i32
    %c0_i32_1 = arith.constant 0 : i32
    return %c0_i32, %c0_i32_0 : i32, i32
  }
  func.func @transform_2(%arg0: i32) -> (i32, i32) {
    %c0_i32 = arith.constant 0 : i32
    %c0_i32_0 = arith.constant 0 : i32
    %c0_i32_1 = arith.constant 0 : i32
    return %c0_i32, %c0_i32_0 : i32, i32
  }
  func.func @transform_3(%arg0: i32) -> (i32, i32) {
    %c0_i32 = arith.constant 0 : i32
    %c0_i32_0 = arith.constant 0 : i32
    %c0_i32_1 = arith.constant 0 : i32
    return %c0_i32, %c0_i32_0 : i32, i32
  }
  func.func @transform_4(%arg0: i32) -> (i32, i32) {
    %c0_i32 = arith.constant 0 : i32
    %c0_i32_0 = arith.constant 0 : i32
    %c0_i32_1 = arith.constant 0 : i32
    return %c0_i32, %c0_i32_0 : i32, i32
  }
  func.func @transform_5(%arg0: i32) -> (i32, i32) {
    %c0_i32 = arith.constant 0 : i32
    %c0_i32_0 = arith.constant 0 : i32
    %c0_i32_1 = arith.constant 0 : i32
    return %c0_i32, %c0_i32_0 : i32, i32
  }
  func.func @transform_6(%arg0: i32) -> (i32, i32) {
    %c0_i32 = arith.constant 0 : i32
    %c0_i32_0 = arith.constant 0 : i32
    %c0_i32_1 = arith.constant 0 : i32
    return %c0_i32, %c0_i32_0 : i32, i32
  }
  func.func @transform_7(%arg0: i32) -> (i32, i32) {
    %c0_i32 = arith.constant 0 : i32
    %c0_i32_0 = arith.constant 0 : i32
    return %arg0, %c0_i32 : i32, i32
  }
}

</mosaic_0001>

<bundles_post_ra>
// kernel: cnn_cifar_forward.3
= control target key start
LH: loop header
LB: loop body
LE: loop exit
PB: predicated region body
PF: predicated region fallthrough
CT: control target
= control target key end

     0   :  { %s2143_s12 = smov 0   ;;  %s2616_s0 = inlined_call_operand.vmem [shape: bf16[2,4,196,80], index: 0, kind: input, shape index: {}]   ;;  %s2617_s1 = inlined_call_operand.vmem [shape: bf16[80,128], index: 1, kind: input, shape index: {}]   ;;  %s2618_s2 = inlined_call_operand.vmem [shape: f32[1,128], index: 2, kind: input, shape index: {}]   ;;  %s2619_s3 = inlined_call_operand.vmem [shape: f32[2,196,128], index: 3, kind: output, shape index: {}]  }
   0x1 LB: > { %s1530_s13 = sadd.s32 4294967295, %s2119_s12   ;;  %p1534_p0 = scmp.ge.s32.totalorder %s2119_s12, 1  ;;  %s2119_s12 = sphi %s2143_s12, %s13_s12  }
   0x2   : > { %p137_p1 = scmp.lt.s32.totalorder %s2119_s12, 3 }
   0x4   : > { %p138_p2 = pnand %p1534_p0, %p137_p1 }
   0x5   : > { %v2056_v0 = vld [vmem:[%s2617_s1] sm:$0xff] (!%p138_p2)   ;;  %v2121_v1 = vmov (!%p138_p2), 0.0   ;;  %v2057_v2 = vld [vmem:[%s2617_s1 + $0x8] sm:$0xff] (!%p138_p2)   ;;  %p161_p3 = scmp.lt.s32.totalorder (!%p138_p2), %s1530_s13, 1  ;;  %vm2122_vm0 = vmmov (!%p138_p2), 0   ;;  %v2058_v3 = vld [vmem:[%s2617_s1 + $0x10] sm:$0xff] (!%p138_p2)  }
   0x6   : > { %141 = sbr.rel (%p138_p2) target bundleno = 447 (0x1bf), region = 32  ;;  %1796 = vmatprep.subr.bf16.mxu0 (!%p138_p2), %v2121_v1  ;;  %1858 = vmatprep.subr.bf16.mxu1 (!%p138_p2), %v2121_v1  ;;  %v2059_v4 = vld [vmem:[%s2617_s1 + $0x18] sm:$0xff] (!%p138_p2)   ;;  %v2060_v5 = vld [vmem:[%s2617_s1 + $0x20] sm:$0xff] (!%p138_p2)   ;;  %vm307_vm1 = vcmask (!%p138_p2), 654336  }
   0x7   : > { %1797 = vmatpush3.bf16.msra.mxu0 (!%p138_p2), %v2056_v0  ;;  %1859 = vmatpush3.bf16.msra.mxu1 (!%p138_p2), %v2056_v0  ;;  %v2405_v58 = vld [vmem:[%s2618_s2] ss:$0 sm:$0xff] (!%p138_p2) }
   0x8   : > { %1798 = vmatprep.subr.bf16.mxu0 (!%p138_p2), %v2121_v1  ;;  %1860 = vmatprep.subr.bf16.mxu1 (!%p138_p2), %v2121_v1 }
   0x9   : > { %1806 = vmatprep.mubr.msk.bf16.mxu0 (!%p138_p2), %vm2122_vm0, %v2121_v1  ;;  %1868 = vmatprep.mubr.msk.bf16.mxu1 (!%p138_p2), %vm2122_vm0, %v2121_v1 }
   0xb   : > { %1799 = vmatpush3.bf16.msra.mxu0 (!%p138_p2), %v2057_v2  ;;  %1861 = vmatpush3.bf16.msra.mxu1 (!%p138_p2), %v2057_v2 }
   0xc   : > { %1800 = vmatprep.subr.bf16.mxu0 (!%p138_p2), %v2121_v1  ;;  %1862 = vmatprep.subr.bf16.mxu1 (!%p138_p2), %v2121_v1 }
   0xd   : > { %s2621_s13 = smov (!%p161_p3, %s1530_s13), 1 }
   0xe   : > { %s2044_s20 = smul.u32 400, %s2621_s13 }
   0xf   : > { %1801 = vmatpush3.bf16.msra.mxu0 %v2058_v3  ;;  %1863 = vmatpush3.bf16.msra.mxu1 %v2058_v3  ;;  %s2045_s30 = smul.u32 200, %s2621_s13 }
  0x10   : > { %s2176_s23 = scalar_lea.vmem %s2616_s0, %s2044_s20  ;;  %1802 = vmatprep.subr.bf16.mxu0 %v2121_v1  ;;  %1864 = vmatprep.subr.bf16.mxu1 %v2121_v1 }
  0x11   : > { %v2061_v6 = vld [vmem:[%s2176_s23] sm:$0xff]   ;;  %v2063_v8 = vld [vmem:[%s2176_s23 + $0x8] sm:$0xff]   ;;  %v2065_v10 = vld [vmem:[%s2176_s23 + $0x10] sm:$0xff]   ;;  %s2515_s6 = scalar_lea.vmem %s2619_s3, %s2045_s30 }
  0x12   : > { %v2062_v7 = vld [vmem:[%s2176_s23 + $0x64] sm:$0xff]   ;;  %v2064_v9 = vld [vmem:[%s2176_s23 + $0x6c] sm:$0xff]   ;;  %v2066_v11 = vld [vmem:[%s2176_s23 + $0x74] sm:$0xff]  }
  0x13   : > { %1803 = vmatpush3.bf16.msra.mxu0 %v2059_v4  ;;  %1865 = vmatpush3.bf16.msra.mxu1 %v2059_v4  ;;  %v2067_v12 = vld [vmem:[%s2176_s23 + $0x18] sm:$0xff]   ;;  %v2069_v14 = vld [vmem:[%s2176_s23 + $0x20] sm:$0xff]   ;;  %v2071_v16 = vld [vmem:[%s2176_s23 + $0x28] sm:$0xff]  }
  0x14   : > { %1804 = vmatprep.subr.bf16.mxu0 %v2121_v1  ;;  %1866 = vmatprep.subr.bf16.mxu1 %v2121_v1  ;;  %v2068_v13 = vld [vmem:[%s2176_s23 + $0x7c] sm:$0xff]   ;;  %v2070_v15 = vld [vmem:[%s2176_s23 + $0x84] sm:$0xff]   ;;  %v2072_v17 = vld [vmem:[%s2176_s23 + $0x8c] sm:$0xff]  }
  0x15   : > { %v2073_v18 = vld [vmem:[%s2176_s23 + $0x30] sm:$0xff]   ;;  %v2075_v20 = vld [vmem:[%s2176_s23 + $0x38] sm:$0xff]   ;;  %v2077_v22 = vld [vmem:[%s2176_s23 + $0x40] sm:$0xff]  }
  0x16   : > { %v2074_v19 = vld [vmem:[%s2176_s23 + $0x94] sm:$0xff]   ;;  %v2076_v21 = vld [vmem:[%s2176_s23 + $0x9c] sm:$0xff]   ;;  %v2078_v23 = vld [vmem:[%s2176_s23 + $0xa4] sm:$0xff]  }
  0x17   : > { %1805 = vmatpush3.bf16.msra.mxu0 %v2060_v5  ;;  %1867 = vmatpush3.bf16.msra.mxu1 %v2060_v5  ;;  %v2079_v24 = vld [vmem:[%s2176_s23 + $0x48] sm:$0xff]   ;;  %v2081_v26 = vld [vmem:[%s2176_s23 + $0x50] sm:$0xff]   ;;  %v2083_v28 = vld [vmem:[%s2176_s23 + $0x58] sm:$0xff]  }
  0x18   : > { %1920 = vmatprep.subr.bf16.mxu0 %v2121_v1  ;;  %1982 = vmatprep.subr.bf16.mxu1 %v2121_v1  ;;  %v2080_v25 = vld [vmem:[%s2176_s23 + $0xac] sm:$0xff]   ;;  %v2082_v27 = vld [vmem:[%s2176_s23 + $0xb4] sm:$0xff]   ;;  %v2084_v29 = vld [vmem:[%s2176_s23 + $0xbc] sm:$0xff]  }
  0x19   : > { %v2085_v30 = vld [vmem:[%s2176_s23 + $0x60] ss:$0 sps:$4 sm:$0x33]   ;;  %v2086_v31 = vld [vmem:[%s2176_s23 + $0xc4] ss:$0 sps:$4 sm:$0x33]  }
  0x1a   : > { %1807 = vmatmul.mubr.msk.bf16.vlgmr.msra.gmra.mrb[0].mxu0 %vm307_vm1, %v2061_v6  ;;  %1869 = vmatmul.mubr.msk.bf16.vlgmr.msra.gmra.mrb[0].mxu1 %vm307_vm1, %v2062_v7  ;;  %v2087_v32 = vld [vmem:[%s2176_s23 + $0xc8] sm:$0xff]   ;;  %v2089_v34 = vld [vmem:[%s2176_s23 + $0xd0] sm:$0xff]   ;;  %v2091_v36 = vld [vmem:[%s2176_s23 + $0xd8] sm:$0xff]  }
  0x1b   : > { %1921 = vmatpush3.bf16.msra.mxu0 %v2056_v0  ;;  %1983 = vmatpush3.bf16.msra.mxu1 %v2056_v0  ;;  %v2088_v33 = vld [vmem:[%s2176_s23 + $0x12c] sm:$0xff]   ;;  %v2090_v35 = vld [vmem:[%s2176_s23 + $0x134] sm:$0xff]   ;;  %v2092_v37 = vld [vmem:[%s2176_s23 + $0x13c] sm:$0xff]  }
  0x1c   : > { %1810 = vmatprep.mubr.msk.bf16.mxu0 %vm2122_vm0, %v2121_v1  ;;  %1872 = vmatprep.mubr.msk.bf16.mxu1 %vm2122_vm0, %v2121_v1  ;;  %v2093_v38 = vld [vmem:[%s2176_s23 + $0xe0] sm:$0xff]   ;;  %v2095_v40 = vld [vmem:[%s2176_s23 + $0xe8] sm:$0xff]   ;;  %v2097_v42 = vld [vmem:[%s2176_s23 + $0xf0] sm:$0xff]  }
  0x1d   : > { %1922 = vmatprep.subr.bf16.mxu0 %v2121_v1  ;;  %1984 = vmatprep.subr.bf16.mxu1 %v2121_v1  ;;  %v2094_v39 = vld [vmem:[%s2176_s23 + $0x144] sm:$0xff]   ;;  %v2096_v41 = vld [vmem:[%s2176_s23 + $0x14c] sm:$0xff]   ;;  %v2098_v43 = vld [vmem:[%s2176_s23 + $0x154] sm:$0xff]  }
  0x1e   : > { %v2099_v44 = vld [vmem:[%s2176_s23 + $0xf8] sm:$0xff]   ;;  %v2101_v46 = vld [vmem:[%s2176_s23 + $0x100] sm:$0xff]   ;;  %v2103_v48 = vld [vmem:[%s2176_s23 + $0x108] sm:$0xff]  }
  0x1f   : > { %1923 = vmatpush3.bf16.msra.mxu0 %v2057_v2  ;;  %1985 = vmatpush3.bf16.msra.mxu1 %v2057_v2  ;;  %v2100_v45 = vld [vmem:[%s2176_s23 + $0x15c] sm:$0xff]   ;;  %v2102_v47 = vld [vmem:[%s2176_s23 + $0x164] sm:$0xff]   ;;  %v2104_v49 = vld [vmem:[%s2176_s23 + $0x16c] sm:$0xff]  }
  0x20   : > { %1924 = vmatprep.subr.bf16.mxu0 %v2121_v1  ;;  %1986 = vmatprep.subr.bf16.mxu1 %v2121_v1  ;;  %v2105_v50 = vld [vmem:[%s2176_s23 + $0x110] sm:$0xff]   ;;  %v2107_v52 = vld [vmem:[%s2176_s23 + $0x118] sm:$0xff]   ;;  %v2109_v54 = vld [vmem:[%s2176_s23 + $0x120] sm:$0xff]  }
  0x21   : > { %v2106_v51 = vld [vmem:[%s2176_s23 + $0x174] sm:$0xff]   ;;  %v2108_v53 = vld [vmem:[%s2176_s23 + $0x17c] sm:$0xff]   ;;  %v2110_v55 = vld [vmem:[%s2176_s23 + $0x184] sm:$0xff]  }
  0x22   : > { %1811 = vmatmul.mubr.msk.bf16.gmra.mrb[4].mxu0 %vm307_vm1, %v2063_v8  ;;  %1873 = vmatmul.mubr.msk.bf16.gmra.mrb[4].mxu1 %vm307_vm1, %v2064_v9  ;;  %v2111_v56 = vld [vmem:[%s2176_s23 + $0x128] ss:$0 sps:$4 sm:$0x33]   ;;  %v2112_v57 = vld [vmem:[%s2176_s23 + $0x18c] ss:$0 sps:$4 sm:$0x33]  }
  0x23   : > { %1814 = vmatprep.mubr.msk.bf16.mxu0 %vm2122_vm0, %v2121_v1  ;;  %1876 = vmatprep.mubr.msk.bf16.mxu1 %vm2122_vm0, %v2121_v1 }
  0x24   : > { %1925 = vmatpush3.bf16.msra.mxu0 %v2058_v3  ;;  %1987 = vmatpush3.bf16.msra.mxu1 %v2058_v3 }
  0x25   : > { %1926 = vmatprep.subr.bf16.mxu0 %v2121_v1  ;;  %1988 = vmatprep.subr.bf16.mxu1 %v2121_v1 }
  0x28   : > { %1927 = vmatpush3.bf16.msra.mxu0 %v2059_v4  ;;  %1989 = vmatpush3.bf16.msra.mxu1 %v2059_v4 }
  0x29   : > { %1928 = vmatprep.subr.bf16.mxu0 %v2121_v1  ;;  %1990 = vmatprep.subr.bf16.mxu1 %v2121_v1 }
  0x2a   : > { %1815 = vmatmul.mubr.msk.bf16.gmra.mrb[8].mxu0 %vm307_vm1, %v2065_v10  ;;  %1877 = vmatmul.mubr.msk.bf16.gmra.mrb[8].mxu1 %vm307_vm1, %v2066_v11 }
  0x2b   : > { %1818 = vmatprep.mubr.msk.bf16.mxu0 %vm2122_vm0, %v2121_v1  ;;  %1880 = vmatprep.mubr.msk.bf16.mxu1 %vm2122_vm0, %v2121_v1 }
  0x2c   : > { %1929 = vmatpush3.bf16.msra.mxu0 %v2060_v5  ;;  %1991 = vmatpush3.bf16.msra.mxu1 %v2060_v5 }
  0x32   : > { %1819 = vmatmul.mubr.msk.bf16.gmra.mrb[12].mxu0 %vm307_vm1, %v2067_v12  ;;  %1881 = vmatmul.mubr.msk.bf16.gmra.mrb[12].mxu1 %vm307_vm1, %v2068_v13 }
  0x33   : > { %1822 = vmatprep.mubr.msk.bf16.mxu0 %vm2122_vm0, %v2121_v1  ;;  %1884 = vmatprep.mubr.msk.bf16.mxu1 %vm2122_vm0, %v2121_v1 }
  0x3a   : > { %1823 = vmatmul.mubr.msk.bf16.gmra.mrb[16].mxu0 %vm307_vm1, %v2069_v14  ;;  %1885 = vmatmul.mubr.msk.bf16.gmra.mrb[16].mxu1 %vm307_vm1, %v2070_v15 }
  0x3b   : > { %1826 = vmatprep.mubr.msk.bf16.mxu0 %vm2122_vm0, %v2121_v1  ;;  %1888 = vmatprep.mubr.msk.bf16.mxu1 %vm2122_vm0, %v2121_v1 }
  0x42   : > { %1827 = vmatmul.mubr.msk.bf16.gmra.mrb[20].mxu0 %vm307_vm1, %v2071_v16  ;;  %1889 = vmatmul.mubr.msk.bf16.gmra.mrb[20].mxu1 %vm307_vm1, %v2072_v17 }
  0x43   : > { %1830 = vmatprep.mubr.msk.bf16.mxu0 %vm2122_vm0, %v2121_v1  ;;  %1892 = vmatprep.mubr.msk.bf16.mxu1 %vm2122_vm0, %v2121_v1 }
  0x4a   : > { %1831 = vmatmul.mubr.msk.bf16.gmra.mrb[24].mxu0 %vm307_vm1, %v2073_v18  ;;  %1893 = vmatmul.mubr.msk.bf16.gmra.mrb[24].mxu1 %vm307_vm1, %v2074_v19 }
  0x4b   : > { %1834 = vmatprep.mubr.msk.bf16.mxu0 %vm2122_vm0, %v2121_v1  ;;  %1896 = vmatprep.mubr.msk.bf16.mxu1 %vm2122_vm0, %v2121_v1 }
  0x52   : > { %1835 = vmatmul.mubr.msk.bf16.gmra.mrb[28].mxu0 %vm307_vm1, %v2075_v20  ;;  %1897 = vmatmul.mubr.msk.bf16.gmra.mrb[28].mxu1 %vm307_vm1, %v2076_v21 }
  0x53   : > { %1838 = vmatprep.mubr.msk.bf16.mxu0 %vm2122_vm0, %v2121_v1  ;;  %1900 = vmatprep.mubr.msk.bf16.mxu1 %vm2122_vm0, %v2121_v1 }
  0x5a   : > { %1839 = vmatmul.mubr.msk.bf16.gmra.mrb[32].mxu0 %vm307_vm1, %v2077_v22  ;;  %1901 = vmatmul.mubr.msk.bf16.gmra.mrb[32].mxu1 %vm307_vm1, %v2078_v23 }
  0x5b   : > { %1842 = vmatprep.mubr.msk.bf16.mxu0 %vm2122_vm0, %v2121_v1  ;;  %1904 = vmatprep.mubr.msk.bf16.mxu1 %vm2122_vm0, %v2121_v1 }
  0x62   : > { %1843 = vmatmul.mubr.msk.bf16.gmra.mrb[36].mxu0 %vm307_vm1, %v2079_v24  ;;  %1905 = vmatmul.mubr.msk.bf16.gmra.mrb[36].mxu1 %vm307_vm1, %v2080_v25 }
  0x63   : > { %1846 = vmatprep.mubr.msk.bf16.mxu0 %vm2122_vm0, %v2121_v1  ;;  %1908 = vmatprep.mubr.msk.bf16.mxu1 %vm2122_vm0, %v2121_v1 }
  0x6a   : > { %1847 = vmatmul.mubr.msk.bf16.gmra.mrb[40].mxu0 %vm307_vm1, %v2081_v26  ;;  %1909 = vmatmul.mubr.msk.bf16.gmra.mrb[40].mxu1 %vm307_vm1, %v2082_v27 }
  0x6b   : > { %1850 = vmatprep.mubr.msk.bf16.mxu0 %vm2122_vm0, %v2121_v1  ;;  %1912 = vmatprep.mubr.msk.bf16.mxu1 %vm2122_vm0, %v2121_v1 }
  0x72   : > { %1851 = vmatmul.mubr.msk.bf16.gmra.mrb[44].mxu0 %vm307_vm1, %v2083_v28  ;;  %1913 = vmatmul.mubr.msk.bf16.gmra.mrb[44].mxu1 %vm307_vm1, %v2084_v29 }
  0x73   : > { %1854 = vmatprep.mubr.msk.bf16.mxu0 %vm2122_vm0, %v2121_v1  ;;  %1916 = vmatprep.mubr.msk.bf16.mxu1 %vm2122_vm0, %v2121_v1 }
  0x7a   : > { %1855 = vmatmul.mubr.msk.bf16.gmra.mrb[48].mxu0 %vm307_vm1, %v2085_v30  ;;  %1917 = vmatmul.mubr.msk.bf16.gmra.mrb[48].mxu1 %vm307_vm1, %v2086_v31 }
  0x7b   : > { %1930 = vmatprep.mubr.msk.bf16.mxu0 %vm2122_vm0, %v2121_v1  ;;  %1992 = vmatprep.mubr.msk.bf16.mxu1 %vm2122_vm0, %v2121_v1 }
  0x82   : > { %1931 = vmatmul.mubr.msk.bf16.vlgmr.msra.gmra.mrb[52].mxu0 %vm307_vm1, %v2087_v32  ;;  %1993 = vmatmul.mubr.msk.bf16.vlgmr.msra.gmra.mrb[52].mxu1 %vm307_vm1, %v2088_v33 }
  0x83   : > { %1934 = vmatprep.mubr.msk.bf16.mxu0 %vm2122_vm0, %v2121_v1  ;;  %1996 = vmatprep.mubr.msk.bf16.mxu1 %vm2122_vm0, %v2121_v1 }
  0x8a   : > { %1935 = vmatmul.mubr.msk.bf16.gmra.mrb[56].mxu0 %vm307_vm1, %v2089_v34  ;;  %1997 = vmatmul.mubr.msk.bf16.gmra.mrb[56].mxu1 %vm307_vm1, %v2090_v35 }
  0x8b   : > { %1938 = vmatprep.mubr.msk.bf16.mxu0 %vm2122_vm0, %v2121_v1  ;;  %2000 = vmatprep.mubr.msk.bf16.mxu1 %vm2122_vm0, %v2121_v1 }
  0x92   : > { %1939 = vmatmul.mubr.msk.bf16.gmra.mrb[60].mxu0 %vm307_vm1, %v2091_v36  ;;  %2001 = vmatmul.mubr.msk.bf16.gmra.mrb[60].mxu1 %vm307_vm1, %v2092_v37 }
  0x93   : > { %1942 = vmatprep.mubr.msk.bf16.mxu0 %vm2122_vm0, %v2121_v1  ;;  %2004 = vmatprep.mubr.msk.bf16.mxu1 %vm2122_vm0, %v2121_v1 }
  0x9a   : > { %1943 = vmatmul.mubr.msk.bf16.gmra.mrb[64].mxu0 %vm307_vm1, %v2093_v38  ;;  %2005 = vmatmul.mubr.msk.bf16.gmra.mrb[64].mxu1 %vm307_vm1, %v2094_v39 }
  0x9b   : > { %1946 = vmatprep.mubr.msk.bf16.mxu0 %vm2122_vm0, %v2121_v1  ;;  %2008 = vmatprep.mubr.msk.bf16.mxu1 %vm2122_vm0, %v2121_v1 }
  0xa2   : > { %1947 = vmatmul.mubr.msk.bf16.gmra.mrb[68].mxu0 %vm307_vm1, %v2095_v40  ;;  %2009 = vmatmul.mubr.msk.bf16.gmra.mrb[68].mxu1 %vm307_vm1, %v2096_v41 }
  0xa3   : > { %1950 = vmatprep.mubr.msk.bf16.mxu0 %vm2122_vm0, %v2121_v1  ;;  %2012 = vmatprep.mubr.msk.bf16.mxu1 %vm2122_vm0, %v2121_v1 }
  0xaa   : > { %1951 = vmatmul.mubr.msk.bf16.gmra.mrb[72].mxu0 %vm307_vm1, %v2097_v42  ;;  %2013 = vmatmul.mubr.msk.bf16.gmra.mrb[72].mxu1 %vm307_vm1, %v2098_v43 }
  0xab   : > { %1954 = vmatprep.mubr.msk.bf16.mxu0 %vm2122_vm0, %v2121_v1  ;;  %2016 = vmatprep.mubr.msk.bf16.mxu1 %vm2122_vm0, %v2121_v1 }
  0xb2   : > { %1955 = vmatmul.mubr.msk.bf16.gmra.mrb[76].mxu0 %vm307_vm1, %v2099_v44  ;;  %2017 = vmatmul.mubr.msk.bf16.gmra.mrb[76].mxu1 %vm307_vm1, %v2100_v45 }
  0xb3   : > { %1958 = vmatprep.mubr.msk.bf16.mxu0 %vm2122_vm0, %v2121_v1  ;;  %2020 = vmatprep.mubr.msk.bf16.mxu1 %vm2122_vm0, %v2121_v1 }
  0xba   : > { %1959 = vmatmul.mubr.msk.bf16.gmra.mrb[80].mxu0 %vm307_vm1, %v2101_v46  ;;  %2021 = vmatmul.mubr.msk.bf16.gmra.mrb[80].mxu1 %vm307_vm1, %v2102_v47 }
  0xbb   : > { %1962 = vmatprep.mubr.msk.bf16.mxu0 %vm2122_vm0, %v2121_v1  ;;  %2024 = vmatprep.mubr.msk.bf16.mxu1 %vm2122_vm0, %v2121_v1 }
  0xc2   : > { %1963 = vmatmul.mubr.msk.bf16.gmra.mrb[84].mxu0 %vm307_vm1, %v2103_v48  ;;  %2025 = vmatmul.mubr.msk.bf16.gmra.mrb[84].mxu1 %vm307_vm1, %v2104_v49 }
  0xc3   : > { %1966 = vmatprep.mubr.msk.bf16.mxu0 %vm2122_vm0, %v2121_v1  ;;  %2028 = vmatprep.mubr.msk.bf16.mxu1 %vm2122_vm0, %v2121_v1 }
  0xca   : > { %1967 = vmatmul.mubr.msk.bf16.gmra.mrb[88].mxu0 %vm307_vm1, %v2105_v50  ;;  %2029 = vmatmul.mubr.msk.bf16.gmra.mrb[88].mxu1 %vm307_vm1, %v2106_v51 }
  0xcb   : > { %1970 = vmatprep.mubr.msk.bf16.mxu0 %vm2122_vm0, %v2121_v1  ;;  %2032 = vmatprep.mubr.msk.bf16.mxu1 %vm2122_vm0, %v2121_v1 }
  0xd2   : > { %1971 = vmatmul.mubr.msk.bf16.gmra.mrb[92].mxu0 %vm307_vm1, %v2107_v52  ;;  %2033 = vmatmul.mubr.msk.bf16.gmra.mrb[92].mxu1 %vm307_vm1, %v2108_v53 }
  0xd3   : > { %1974 = vmatprep.mubr.msk.bf16.mxu0 %vm2122_vm0, %v2121_v1  ;;  %2036 = vmatprep.mubr.msk.bf16.mxu1 %vm2122_vm0, %v2121_v1 }
  0xda   : > { %1975 = vmatmul.mubr.msk.bf16.gmra.mrb[96].mxu0 %vm307_vm1, %v2109_v54  ;;  %2037 = vmatmul.mubr.msk.bf16.gmra.mrb[96].mxu1 %vm307_vm1, %v2110_v55 }
  0xdb   : > { %1978 = vmatprep.mubr.msk.bf16.mxu0 %vm2122_vm0, %v2121_v1  ;;  %2040 = vmatprep.mubr.msk.bf16.mxu1 %vm2122_vm0, %v2121_v1 }
  0xe2   : > { %1979 = vmatmul.mubr.msk.bf16.gmra.mrb[100].mxu0 %vm307_vm1, %v2111_v56  ;;  %2041 = vmatmul.mubr.msk.bf16.gmra.mrb[100].mxu1 %vm307_vm1, %v2112_v57 }
  0xed   : > { %v381_v59 = vpop.f32.mrb[0].mxu0  ;;  %v670_v60 = vpop.f32.mrb[0].mxu1 }
  0xee   : > { %v382_v61 = vadd.f32 %v2405_v58, %v381_v59  ;;  %v671_v62 = vadd.f32 %v2405_v58, %v670_v60  ;;  %v1808_v63 = vpop.f32.mrb[1].mxu0  ;;  %v1870_v0 = vpop.f32.mrb[1].mxu1 }
  0xef   : > { %v384_v1 = vpop.f32.mrb[2].mxu0  ;;  %v673_v2 = vpop.f32.mrb[2].mxu1 }
  0xf0   : > { %v483_v3 = vmax.f32 %v382_v61, 0.0  ;;  %v772_v4 = vmax.f32 %v671_v62, 0.0  ;;  %v385_v5 = vadd.f32 %v2405_v58, %v384_v1  ;;  %v674_v6 = vadd.f32 %v2405_v58, %v673_v2  ;;  %v1809_v7 = vpop.f32.mrb[3].mxu0  ;;  %v1871_v8 = vpop.f32.mrb[3].mxu1 }
  0xf2   : > { %v2411_v9 = vmax.f32 %v483_v3, %v772_v4  ;;  %v484_v10 = vmax.f32 %v385_v5, 0.0  ;;  %v773_v11 = vmax.f32 %v674_v6, 0.0 }
  0xf4   : > { %v2413_v12 = vmax.f32 %v484_v10, %v773_v11 }
  0xf5   : > { %v389_v13 = vpop.f32.mrb[4].mxu0  ;;  %v678_v14 = vpop.f32.mrb[4].mxu1 }
  0xf6   : > { %v390_v15 = vadd.f32 %v2405_v58, %v389_v13  ;;  %v679_v16 = vadd.f32 %v2405_v58, %v678_v14  ;;  %v1812_v17 = vpop.f32.mrb[5].mxu0  ;;  %v1874_v18 = vpop.f32.mrb[5].mxu1 }
  0xf7   : > { %v392_v19 = vpop.f32.mrb[6].mxu0  ;;  %v681_v20 = vpop.f32.mrb[6].mxu1 }
  0xf8   : > { %v485_v21 = vmax.f32 %v390_v15, 0.0  ;;  %v774_v22 = vmax.f32 %v679_v16, 0.0  ;;  %v393_v23 = vadd.f32 %v2405_v58, %v392_v19  ;;  %v682_v24 = vadd.f32 %v2405_v58, %v681_v20  ;;  %v1813_v25 = vpop.f32.mrb[7].mxu0  ;;  %v1875_v26 = vpop.f32.mrb[7].mxu1 }
  0xfa   : > { %v2419_v27 = vmax.f32 %v485_v21, %v774_v22  ;;  %v486_v28 = vmax.f32 %v393_v23, 0.0  ;;  %v775_v29 = vmax.f32 %v682_v24, 0.0 }
  0xfc   : > { %v2421_v30 = vmax.f32 %v486_v28, %v775_v29 }
  0xfd   : > { %v397_v31 = vpop.f32.mrb[8].mxu0  ;;  %v686_v32 = vpop.f32.mrb[8].mxu1 }
  0xfe   : > { %v398_v33 = vadd.f32 %v2405_v58, %v397_v31  ;;  %v687_v34 = vadd.f32 %v2405_v58, %v686_v32  ;;  %v1816_v35 = vpop.f32.mrb[9].mxu0  ;;  %v1878_v36 = vpop.f32.mrb[9].mxu1 }
  0xff   : > { %v400_v37 = vpop.f32.mrb[10].mxu0  ;;  %v689_v38 = vpop.f32.mrb[10].mxu1 }
 0x100   : > { %v487_v39 = vmax.f32 %v398_v33, 0.0  ;;  %v776_v40 = vmax.f32 %v687_v34, 0.0  ;;  %v401_v41 = vadd.f32 %v2405_v58, %v400_v37  ;;  %v690_v42 = vadd.f32 %v2405_v58, %v689_v38  ;;  %v1817_v43 = vpop.f32.mrb[11].mxu0  ;;  %v1879_v44 = vpop.f32.mrb[11].mxu1 }
 0x102   : > { %v2427_v45 = vmax.f32 %v487_v39, %v776_v40  ;;  %v488_v46 = vmax.f32 %v401_v41, 0.0  ;;  %v777_v47 = vmax.f32 %v690_v42, 0.0 }
 0x104   : > { %v2429_v48 = vmax.f32 %v488_v46, %v777_v47 }
 0x105   : > { %v405_v49 = vpop.f32.mrb[12].mxu0  ;;  %v694_v50 = vpop.f32.mrb[12].mxu1 }
 0x106   : > { %v406_v51 = vadd.f32 %v2405_v58, %v405_v49  ;;  %v695_v52 = vadd.f32 %v2405_v58, %v694_v50  ;;  %v1820_v53 = vpop.f32.mrb[13].mxu0  ;;  %v1882_v54 = vpop.f32.mrb[13].mxu1 }
 0x107   : > { %v408_v55 = vpop.f32.mrb[14].mxu0  ;;  %v697_v56 = vpop.f32.mrb[14].mxu1 }
 0x108   : > { %v489_v57 = vmax.f32 %v406_v51, 0.0  ;;  %v778_v59 = vmax.f32 %v695_v52, 0.0  ;;  %v409_v60 = vadd.f32 %v2405_v58, %v408_v55  ;;  %v698_v61 = vadd.f32 %v2405_v58, %v697_v56  ;;  %v1821_v62 = vpop.f32.mrb[15].mxu0  ;;  %v1883_v63 = vpop.f32.mrb[15].mxu1 }
 0x10a   : > { %v2435_v0 = vmax.f32 %v489_v57, %v778_v59  ;;  %v490_v1 = vmax.f32 %v409_v60, 0.0  ;;  %v779_v2 = vmax.f32 %v698_v61, 0.0 }
 0x10c   : > { %v2437_v3 = vmax.f32 %v490_v1, %v779_v2 }
 0x10d   : > { %v413_v4 = vpop.f32.mrb[16].mxu0  ;;  %v702_v5 = vpop.f32.mrb[16].mxu1 }
 0x10e   : > { %v414_v6 = vadd.f32 %v2405_v58, %v413_v4  ;;  %v703_v7 = vadd.f32 %v2405_v58, %v702_v5  ;;  %v1824_v8 = vpop.f32.mrb[17].mxu0  ;;  %v1886_v10 = vpop.f32.mrb[17].mxu1 }
 0x10f   : > { %v416_v11 = vpop.f32.mrb[18].mxu0  ;;  %v705_v13 = vpop.f32.mrb[18].mxu1 }
 0x110   : > { %v491_v14 = vmax.f32 %v414_v6, 0.0  ;;  %v780_v15 = vmax.f32 %v703_v7, 0.0  ;;  %v417_v16 = vadd.f32 %v2405_v58, %v416_v11  ;;  %v706_v17 = vadd.f32 %v2405_v58, %v705_v13  ;;  %v1825_v18 = vpop.f32.mrb[19].mxu0  ;;  %v1887_v19 = vpop.f32.mrb[19].mxu1 }
 0x112   : > { %v2443_v20 = vmax.f32 %v491_v14, %v780_v15  ;;  %v492_v21 = vmax.f32 %v417_v16, 0.0  ;;  %v781_v22 = vmax.f32 %v706_v17, 0.0 }
 0x114   : > { %v2445_v23 = vmax.f32 %v492_v21, %v781_v22 }
 0x115   : > { %v421_v24 = vpop.f32.mrb[20].mxu0  ;;  %v710_v25 = vpop.f32.mrb[20].mxu1 }
 0x116   : > { %v422_v26 = vadd.f32 %v2405_v58, %v421_v24  ;;  %v711_v28 = vadd.f32 %v2405_v58, %v710_v25  ;;  %v1828_v29 = vpop.f32.mrb[21].mxu0  ;;  %v1890_v31 = vpop.f32.mrb[21].mxu1 }
 0x117   : > { %v424_v32 = vpop.f32.mrb[22].mxu0  ;;  %v713_v33 = vpop.f32.mrb[22].mxu1 }
 0x118   : > { %v493_v34 = vmax.f32 %v422_v26, 0.0  ;;  %v782_v35 = vmax.f32 %v711_v28, 0.0  ;;  %v425_v36 = vadd.f32 %v2405_v58, %v424_v32  ;;  %v714_v37 = vadd.f32 %v2405_v58, %v713_v33  ;;  %v1829_v38 = vpop.f32.mrb[23].mxu0  ;;  %v1891_v39 = vpop.f32.mrb[23].mxu1 }
 0x11a   : > { %v2451_v40 = vmax.f32 %v493_v34, %v782_v35  ;;  %v494_v41 = vmax.f32 %v425_v36, 0.0  ;;  %v783_v42 = vmax.f32 %v714_v37, 0.0 }
 0x11c   : > { %v2453_v43 = vmax.f32 %v494_v41, %v783_v42 }
 0x11d   : > { %v429_v44 = vpop.f32.mrb[24].mxu0  ;;  %v718_v46 = vpop.f32.mrb[24].mxu1 }
 0x11e   : > { %v430_v47 = vadd.f32 %v2405_v58, %v429_v44  ;;  %v719_v49 = vadd.f32 %v2405_v58, %v718_v46  ;;  %v1832_v50 = vpop.f32.mrb[25].mxu0  ;;  %v1894_v51 = vpop.f32.mrb[25].mxu1 }
 0x11f   : > { %v432_v52 = vpop.f32.mrb[26].mxu0  ;;  %v721_v53 = vpop.f32.mrb[26].mxu1 }
 0x120   : > { %v495_v54 = vmax.f32 %v430_v47, 0.0  ;;  %v784_v55 = vmax.f32 %v719_v49, 0.0  ;;  %v433_v56 = vadd.f32 %v2405_v58, %v432_v52  ;;  %v722_v57 = vadd.f32 %v2405_v58, %v721_v53  ;;  %v1833_v59 = vpop.f32.mrb[27].mxu0  ;;  %v1895_v60 = vpop.f32.mrb[27].mxu1 }
 0x122   : > { %v2459_v61 = vmax.f32 %v495_v54, %v784_v55  ;;  %v496_v62 = vmax.f32 %v433_v56, 0.0  ;;  %v785_v63 = vmax.f32 %v722_v57, 0.0 }
 0x124   : > { %v2461_v1 = vmax.f32 %v496_v62, %v785_v63 }
 0x125   : > { %v437_v2 = vpop.f32.mrb[28].mxu0  ;;  %v726_v4 = vpop.f32.mrb[28].mxu1 }
 0x126   : > { %v438_v5 = vadd.f32 %v2405_v58, %v437_v2  ;;  %v727_v6 = vadd.f32 %v2405_v58, %v726_v4  ;;  %v1836_v7 = vpop.f32.mrb[29].mxu0  ;;  %v1898_v8 = vpop.f32.mrb[29].mxu1 }
 0x127   : > { %v440_v10 = vpop.f32.mrb[30].mxu0  ;;  %v729_v11 = vpop.f32.mrb[30].mxu1 }
 0x128   : > { %v497_v13 = vmax.f32 %v438_v5, 0.0  ;;  %v786_v14 = vmax.f32 %v727_v6, 0.0  ;;  %v441_v15 = vadd.f32 %v2405_v58, %v440_v10  ;;  %v730_v16 = vadd.f32 %v2405_v58, %v729_v11  ;;  %v1837_v17 = vpop.f32.mrb[31].mxu0  ;;  %v1899_v18 = vpop.f32.mrb[31].mxu1 }
 0x12a   : > { %v2467_v19 = vmax.f32 %v497_v13, %v786_v14  ;;  %v498_v21 = vmax.f32 %v441_v15, 0.0  ;;  %v787_v22 = vmax.f32 %v730_v16, 0.0 }
 0x12c   : > { %v2469_v24 = vmax.f32 %v498_v21, %v787_v22 }
 0x12d   : > { %v445_v25 = vpop.f32.mrb[32].mxu0  ;;  %v734_v26 = vpop.f32.mrb[32].mxu1 }
 0x12e   : > { %v446_v28 = vadd.f32 %v2405_v58, %v445_v25  ;;  %v735_v29 = vadd.f32 %v2405_v58, %v734_v26  ;;  %v1840_v31 = vpop.f32.mrb[33].mxu0  ;;  %v1902_v32 = vpop.f32.mrb[33].mxu1 }
 0x12f   : > { %v448_v33 = vpop.f32.mrb[34].mxu0  ;;  %v737_v34 = vpop.f32.mrb[34].mxu1 }
 0x130   : > { %v499_v35 = vmax.f32 %v446_v28, 0.0  ;;  %v788_v36 = vmax.f32 %v735_v29, 0.0  ;;  %v449_v37 = vadd.f32 %v2405_v58, %v448_v33  ;;  %v738_v38 = vadd.f32 %v2405_v58, %v737_v34  ;;  %v1841_v39 = vpop.f32.mrb[35].mxu0  ;;  %v1903_v41 = vpop.f32.mrb[35].mxu1 }
 0x132   : > { %v2475_v42 = vmax.f32 %v499_v35, %v788_v36  ;;  %v500_v44 = vmax.f32 %v449_v37, 0.0  ;;  %v789_v46 = vmax.f32 %v738_v38, 0.0 }
 0x134   : > { %v2477_v47 = vmax.f32 %v500_v44, %v789_v46 }
 0x135   : > { %v453_v49 = vpop.f32.mrb[36].mxu0  ;;  %v742_v50 = vpop.f32.mrb[36].mxu1 }
 0x136   : > { %v454_v51 = vadd.f32 %v2405_v58, %v453_v49  ;;  %v743_v52 = vadd.f32 %v2405_v58, %v742_v50  ;;  %v1844_v53 = vpop.f32.mrb[37].mxu0  ;;  %v1906_v54 = vpop.f32.mrb[37].mxu1 }
 0x137   : > { %v456_v55 = vpop.f32.mrb[38].mxu0  ;;  %v745_v56 = vpop.f32.mrb[38].mxu1 }
 0x138   : > { %v501_v57 = vmax.f32 %v454_v51, 0.0  ;;  %v790_v59 = vmax.f32 %v743_v52, 0.0  ;;  %v457_v60 = vadd.f32 %v2405_v58, %v456_v55  ;;  %v746_v62 = vadd.f32 %v2405_v58, %v745_v56  ;;  %v1845_v63 = vpop.f32.mrb[39].mxu0  ;;  %v1907_v2 = vpop.f32.mrb[39].mxu1 }
 0x13a   : > { %v2483_v4 = vmax.f32 %v501_v57, %v790_v59  ;;  %v502_v5 = vmax.f32 %v457_v60, 0.0  ;;  %v791_v6 = vmax.f32 %v746_v62, 0.0 }
 0x13c   : > { %v2485_v7 = vmax.f32 %v502_v5, %v791_v6 }
 0x13d   : > { %v461_v8 = vpop.f32.mrb[40].mxu0  ;;  %v750_v10 = vpop.f32.mrb[40].mxu1 }
 0x13e   : > { %v462_v11 = vadd.f32 %v2405_v58, %v461_v8  ;;  %v751_v13 = vadd.f32 %v2405_v58, %v750_v10  ;;  %v1848_v14 = vpop.f32.mrb[41].mxu0  ;;  %v1910_v15 = vpop.f32.mrb[41].mxu1 }
 0x13f   : > { %v464_v16 = vpop.f32.mrb[42].mxu0  ;;  %v753_v17 = vpop.f32.mrb[42].mxu1 }
 0x140   : > { %v503_v18 = vmax.f32 %v462_v11, 0.0  ;;  %v792_v21 = vmax.f32 %v751_v13, 0.0  ;;  %v465_v22 = vadd.f32 %v2405_v58, %v464_v16  ;;  %v754_v25 = vadd.f32 %v2405_v58, %v753_v17  ;;  %v1849_v26 = vpop.f32.mrb[43].mxu0  ;;  %v1911_v28 = vpop.f32.mrb[43].mxu1 }
 0x142   : > { %v2491_v29 = vmax.f32 %v503_v18, %v792_v21  ;;  %v504_v31 = vmax.f32 %v465_v22, 0.0  ;;  %v793_v32 = vmax.f32 %v754_v25, 0.0 }
 0x144   : > { %v2493_v33 = vmax.f32 %v504_v31, %v793_v32 }
 0x145   : > { %v469_v34 = vpop.f32.mrb[44].mxu0  ;;  %v758_v35 = vpop.f32.mrb[44].mxu1 }
 0x146   : > { %v470_v36 = vadd.f32 %v2405_v58, %v469_v34  ;;  %v759_v37 = vadd.f32 %v2405_v58, %v758_v35  ;;  %v1852_v38 = vpop.f32.mrb[45].mxu0  ;;  %v1914_v39 = vpop.f32.mrb[45].mxu1 }
 0x147   : > { %v472_v41 = vpop.f32.mrb[46].mxu0  ;;  %v761_v44 = vpop.f32.mrb[46].mxu1 }
 0x148   : > { %v505_v46 = vmax.f32 %v470_v36, 0.0  ;;  %v794_v49 = vmax.f32 %v759_v37, 0.0  ;;  %v473_v50 = vadd.f32 %v2405_v58, %v472_v41  ;;  %v762_v51 = vadd.f32 %v2405_v58, %v761_v44  ;;  %v1853_v52 = vpop.f32.mrb[47].mxu0  ;;  %v1915_v53 = vpop.f32.mrb[47].mxu1 }
 0x14a   : > { %v2499_v54 = vmax.f32 %v505_v46, %v794_v49  ;;  %v506_v55 = vmax.f32 %v473_v50, 0.0  ;;  %v795_v56 = vmax.f32 %v762_v51, 0.0 }
 0x14c   : > { %v2501_v57 = vmax.f32 %v506_v55, %v795_v56 }
 0x14d   : > { %v477_v59 = vpop.f32.mrb[48].mxu0  ;;  %v766_v60 = vpop.f32.mrb[48].mxu1 }
 0x14e   : > { %v478_v62 = vadd.f32 %v2405_v58, %v477_v59  ;;  %v767_v63 = vadd.f32 %v2405_v58, %v766_v60  ;;  %v1856_v2 = vpop.f32.mrb[49].mxu0  ;;  %v1918_v5 = vpop.f32.mrb[49].mxu1 }
 0x14f   : > { %v480_v6 = vpop.f32.mrb[50].mxu0  ;;  %v769_v8 = vpop.f32.mrb[50].mxu1 }
 0x150   : > { %v507_v10 = vmax.f32 %v478_v62, 0.0  ;;  %v796_v11 = vmax.f32 %v767_v63, 0.0  ;;  %v1857_v13 = vpop.f32.mrb[51].mxu0  ;;  %v1919_v14 = vpop.f32.mrb[51].mxu1 }
 0x152   : > { %v2505_v15 = vmax.f32 %v507_v10, %v796_v11 }
 0x155   : > { %v984_v16 = vpop.f32.mrb[52].mxu0  ;;  %v1273_v17 = vpop.f32.mrb[52].mxu1 }
 0x156   : > { %v985_v18 = vadd.f32 %v2405_v58, %v984_v16  ;;  %v1274_v21 = vadd.f32 %v2405_v58, %v1273_v17  ;;  %v1932_v22 = vpop.f32.mrb[53].mxu0  ;;  %v1994_v25 = vpop.f32.mrb[53].mxu1 }
 0x157   : > { %v987_v26 = vpop.f32.mrb[54].mxu0  ;;  %v1276_v28 = vpop.f32.mrb[54].mxu1 }
 0x158   : > { %v1086_v31 = vmax.f32 %v985_v18, 0.0  ;;  %v1375_v32 = vmax.f32 %v1274_v21, 0.0  ;;  %v988_v34 = vadd.f32 %v2405_v58, %v987_v26  ;;  %v1277_v35 = vadd.f32 %v2405_v58, %v1276_v28  ;;  %v1933_v36 = vpop.f32.mrb[55].mxu0  ;;  %v1995_v37 = vpop.f32.mrb[55].mxu1 }
 0x15a   : > { %v1400_v38 = vmax.f32 %v1086_v31, %v1375_v32  ;;  %v1087_v39 = vmax.f32 %v988_v34, 0.0  ;;  %v1376_v41 = vmax.f32 %v1277_v35, 0.0 }
 0x15c   : > { %v1425_v44 = vmax.f32 %v2411_v9, %v1400_v38  ;;  %v1401_v46 = vmax.f32 %v1087_v39, %v1376_v41 }
 0x15d   : > { %v992_v49 = vpop.f32.mrb[56].mxu0  ;;  %v1281_v50 = vpop.f32.mrb[56].mxu1 }
 0x15e   : > { %1450 = vst [vmem:[%s2515_s6] sm:$0xff] %v1425_v44  ;;  %v1426_v51 = vmax.f32 %v2413_v12, %v1401_v46  ;;  %v993_v52 = vadd.f32 %v2405_v58, %v992_v49  ;;  %v1282_v53 = vadd.f32 %v2405_v58, %v1281_v50  ;;  %v1936_v55 = vpop.f32.mrb[57].mxu0  ;;  %v1998_v56 = vpop.f32.mrb[57].mxu1 }
 0x15f   : > { %v995_v59 = vpop.f32.mrb[58].mxu0  ;;  %v1284_v60 = vpop.f32.mrb[58].mxu1 }
 0x160   : > { %1451 = vst [vmem:[%s2515_s6 + $0x8] sm:$0xff] %v1426_v51  ;;  %v1088_v62 = vmax.f32 %v993_v52, 0.0  ;;  %v1377_v63 = vmax.f32 %v1282_v53, 0.0  ;;  %v996_v9 = vadd.f32 %v2405_v58, %v995_v59  ;;  %v1285_v2 = vadd.f32 %v2405_v58, %v1284_v60  ;;  %v1937_v5 = vpop.f32.mrb[59].mxu0  ;;  %v1999_v6 = vpop.f32.mrb[59].mxu1 }
 0x162   : > { %v1402_v12 = vmax.f32 %v1088_v62, %v1377_v63  ;;  %v1089_v8 = vmax.f32 %v996_v9, 0.0  ;;  %v1378_v10 = vmax.f32 %v1285_v2, 0.0 }
 0x164   : > { %v1427_v11 = vmax.f32 %v2419_v27, %v1402_v12  ;;  %v1403_v13 = vmax.f32 %v1089_v8, %v1378_v10 }
 0x165   : > { %v1000_v14 = vpop.f32.mrb[60].mxu0  ;;  %v1289_v16 = vpop.f32.mrb[60].mxu1 }
 0x166   : > { %1452 = vst [vmem:[%s2515_s6 + $0x10] sm:$0xff] %v1427_v11  ;;  %v1428_v17 = vmax.f32 %v2421_v30, %v1403_v13  ;;  %v1001_v18 = vadd.f32 %v2405_v58, %v1000_v14  ;;  %v1290_v21 = vadd.f32 %v2405_v58, %v1289_v16  ;;  %v1940_v22 = vpop.f32.mrb[61].mxu0  ;;  %v2002_v25 = vpop.f32.mrb[61].mxu1 }
 0x167   : > { %v1003_v26 = vpop.f32.mrb[62].mxu0  ;;  %v1292_v28 = vpop.f32.mrb[62].mxu1 }
 0x168   : > { %1453 = vst [vmem:[%s2515_s6 + $0x18] sm:$0xff] %v1428_v17  ;;  %v1090_v31 = vmax.f32 %v1001_v18, 0.0  ;;  %v1379_v32 = vmax.f32 %v1290_v21, 0.0  ;;  %v1004_v27 = vadd.f32 %v2405_v58, %v1003_v26  ;;  %v1293_v34 = vadd.f32 %v2405_v58, %v1292_v28  ;;  %v1941_v35 = vpop.f32.mrb[63].mxu0  ;;  %v2003_v36 = vpop.f32.mrb[63].mxu1 }
 0x16a   : > { %v1404_v30 = vmax.f32 %v1090_v31, %v1379_v32  ;;  %v1091_v37 = vmax.f32 %v1004_v27, 0.0  ;;  %v1380_v38 = vmax.f32 %v1293_v34, 0.0 }
 0x16c   : > { %v1429_v39 = vmax.f32 %v2427_v45, %v1404_v30  ;;  %v1405_v41 = vmax.f32 %v1091_v37, %v1380_v38 }
 0x16d   : > { %v1008_v44 = vpop.f32.mrb[64].mxu0  ;;  %v1297_v46 = vpop.f32.mrb[64].mxu1 }
 0x16e   : > { %1454 = vst [vmem:[%s2515_s6 + $0x20] sm:$0xff] %v1429_v39  ;;  %v1430_v49 = vmax.f32 %v2429_v48, %v1405_v41  ;;  %v1009_v50 = vadd.f32 %v2405_v58, %v1008_v44  ;;  %v1298_v51 = vadd.f32 %v2405_v58, %v1297_v46  ;;  %v1944_v52 = vpop.f32.mrb[65].mxu0  ;;  %v2006_v53 = vpop.f32.mrb[65].mxu1 }
 0x16f   : > { %v1011_v55 = vpop.f32.mrb[66].mxu0  ;;  %v1300_v56 = vpop.f32.mrb[66].mxu1 }
 0x170   : > { %1455 = vst [vmem:[%s2515_s6 + $0x28] sm:$0xff] %v1430_v49  ;;  %v1092_v59 = vmax.f32 %v1009_v50, 0.0  ;;  %v1381_v60 = vmax.f32 %v1298_v51, 0.0  ;;  %v1012_v45 = vadd.f32 %v2405_v58, %v1011_v55  ;;  %v1301_v62 = vadd.f32 %v2405_v58, %v1300_v56  ;;  %v1945_v63 = vpop.f32.mrb[67].mxu0  ;;  %v2007_v9 = vpop.f32.mrb[67].mxu1 }
 0x172   : > { %v1406_v48 = vmax.f32 %v1092_v59, %v1381_v60  ;;  %v1093_v2 = vmax.f32 %v1012_v45, 0.0  ;;  %v1382_v5 = vmax.f32 %v1301_v62, 0.0 }
 0x174   : > { %v1431_v6 = vmax.f32 %v2435_v0, %v1406_v48  ;;  %v1407_v12 = vmax.f32 %v1093_v2, %v1382_v5 }
 0x175   : > { %v1016_v8 = vpop.f32.mrb[68].mxu0  ;;  %v1305_v10 = vpop.f32.mrb[68].mxu1 }
 0x176   : > { %1456 = vst [vmem:[%s2515_s6 + $0x30] sm:$0xff] %v1431_v6  ;;  %v1432_v11 = vmax.f32 %v2437_v3, %v1407_v12  ;;  %v1017_v13 = vadd.f32 %v2405_v58, %v1016_v8  ;;  %v1306_v14 = vadd.f32 %v2405_v58, %v1305_v10  ;;  %v1948_v16 = vpop.f32.mrb[69].mxu0  ;;  %v2010_v17 = vpop.f32.mrb[69].mxu1 }
 0x177   : > { %v1019_v18 = vpop.f32.mrb[70].mxu0  ;;  %v1308_v21 = vpop.f32.mrb[70].mxu1 }
 0x178   : > { %1457 = vst [vmem:[%s2515_s6 + $0x38] sm:$0xff] %v1432_v11  ;;  %v1094_v22 = vmax.f32 %v1017_v13, 0.0  ;;  %v1383_v25 = vmax.f32 %v1306_v14, 0.0  ;;  %v1020_v0 = vadd.f32 %v2405_v58, %v1019_v18  ;;  %v1309_v26 = vadd.f32 %v2405_v58, %v1308_v21  ;;  %v1949_v28 = vpop.f32.mrb[71].mxu0  ;;  %v2011_v31 = vpop.f32.mrb[71].mxu1 }
 0x17a   : > { %v1408_v3 = vmax.f32 %v1094_v22, %v1383_v25  ;;  %v1095_v32 = vmax.f32 %v1020_v0, 0.0  ;;  %v1384_v27 = vmax.f32 %v1309_v26, 0.0 }
 0x17c   : > { %v1433_v34 = vmax.f32 %v2443_v20, %v1408_v3  ;;  %v1409_v35 = vmax.f32 %v1095_v32, %v1384_v27 }
 0x17d   : > { %v1024_v36 = vpop.f32.mrb[72].mxu0  ;;  %v1313_v30 = vpop.f32.mrb[72].mxu1 }
 0x17e   : > { %1458 = vst [vmem:[%s2515_s6 + $0x40] sm:$0xff] %v1433_v34  ;;  %v1434_v37 = vmax.f32 %v2445_v23, %v1409_v35  ;;  %v1025_v38 = vadd.f32 %v2405_v58, %v1024_v36  ;;  %v1314_v39 = vadd.f32 %v2405_v58, %v1313_v30  ;;  %v1952_v41 = vpop.f32.mrb[73].mxu0  ;;  %v2014_v44 = vpop.f32.mrb[73].mxu1 }
 0x17f   : > { %v1027_v46 = vpop.f32.mrb[74].mxu0  ;;  %v1316_v49 = vpop.f32.mrb[74].mxu1 }
 0x180   : > { %1459 = vst [vmem:[%s2515_s6 + $0x48] sm:$0xff] %v1434_v37  ;;  %v1096_v50 = vmax.f32 %v1025_v38, 0.0  ;;  %v1385_v51 = vmax.f32 %v1314_v39, 0.0  ;;  %v1028_v20 = vadd.f32 %v2405_v58, %v1027_v46  ;;  %v1317_v52 = vadd.f32 %v2405_v58, %v1316_v49  ;;  %v1953_v53 = vpop.f32.mrb[75].mxu0  ;;  %v2015_v55 = vpop.f32.mrb[75].mxu1 }
 0x182   : > { %v1410_v23 = vmax.f32 %v1096_v50, %v1385_v51  ;;  %v1097_v56 = vmax.f32 %v1028_v20, 0.0  ;;  %v1386_v59 = vmax.f32 %v1317_v52, 0.0 }
 0x184   : > { %v1435_v60 = vmax.f32 %v2451_v40, %v1410_v23  ;;  %v1411_v45 = vmax.f32 %v1097_v56, %v1386_v59 }
 0x185   : > { %v1032_v62 = vpop.f32.mrb[76].mxu0  ;;  %v1321_v63 = vpop.f32.mrb[76].mxu1 }
 0x186   : > { %1460 = vst [vmem:[%s2515_s6 + $0x50] sm:$0xff] %v1435_v60  ;;  %v1436_v9 = vmax.f32 %v2453_v43, %v1411_v45  ;;  %v1033_v48 = vadd.f32 %v2405_v58, %v1032_v62  ;;  %v1322_v2 = vadd.f32 %v2405_v58, %v1321_v63  ;;  %v1956_v5 = vpop.f32.mrb[77].mxu0  ;;  %v2018_v6 = vpop.f32.mrb[77].mxu1 }
 0x187   : > { %v1035_v12 = vpop.f32.mrb[78].mxu0  ;;  %v1324_v8 = vpop.f32.mrb[78].mxu1 }
 0x188   : > { %1461 = vst [vmem:[%s2515_s6 + $0x58] sm:$0xff] %v1436_v9  ;;  %v1098_v10 = vmax.f32 %v1033_v48, 0.0  ;;  %v1387_v11 = vmax.f32 %v1322_v2, 0.0  ;;  %v1036_v40 = vadd.f32 %v2405_v58, %v1035_v12  ;;  %v1325_v13 = vadd.f32 %v2405_v58, %v1324_v8  ;;  %v1957_v14 = vpop.f32.mrb[79].mxu0  ;;  %v2019_v16 = vpop.f32.mrb[79].mxu1 }
 0x18a   : > { %v1412_v43 = vmax.f32 %v1098_v10, %v1387_v11  ;;  %v1099_v17 = vmax.f32 %v1036_v40, 0.0  ;;  %v1388_v18 = vmax.f32 %v1325_v13, 0.0 }
 0x18c   : > { %v1437_v21 = vmax.f32 %v2459_v61, %v1412_v43  ;;  %v1413_v22 = vmax.f32 %v1099_v17, %v1388_v18 }
 0x18d   : > { %v1040_v25 = vpop.f32.mrb[80].mxu0  ;;  %v1329_v0 = vpop.f32.mrb[80].mxu1 }
 0x18e   : > { %1462 = vst [vmem:[%s2515_s6 + $0x60] sm:$0xff] %v1437_v21  ;;  %v1438_v26 = vmax.f32 %v2461_v1, %v1413_v22  ;;  %v1041_v28 = vadd.f32 %v2405_v58, %v1040_v25  ;;  %v1330_v31 = vadd.f32 %v2405_v58, %v1329_v0  ;;  %v1960_v3 = vpop.f32.mrb[81].mxu0  ;;  %v2022_v32 = vpop.f32.mrb[81].mxu1 }
 0x18f   : > { %v1043_v27 = vpop.f32.mrb[82].mxu0  ;;  %v1332_v34 = vpop.f32.mrb[82].mxu1 }
 0x190   : > { %1463 = vst [vmem:[%s2515_s6 + $0x68] sm:$0xff] %v1438_v26  ;;  %v1100_v35 = vmax.f32 %v1041_v28, 0.0  ;;  %v1389_v36 = vmax.f32 %v1330_v31, 0.0  ;;  %v1044_v61 = vadd.f32 %v2405_v58, %v1043_v27  ;;  %v1333_v30 = vadd.f32 %v2405_v58, %v1332_v34  ;;  %v1961_v37 = vpop.f32.mrb[83].mxu0  ;;  %v2023_v38 = vpop.f32.mrb[83].mxu1 }
 0x192   : > { %v1414_v1 = vmax.f32 %v1100_v35, %v1389_v36  ;;  %v1101_v39 = vmax.f32 %v1044_v61, 0.0  ;;  %v1390_v41 = vmax.f32 %v1333_v30, 0.0 }
 0x194   : > { %v1439_v44 = vmax.f32 %v2467_v19, %v1414_v1  ;;  %v1415_v46 = vmax.f32 %v1101_v39, %v1390_v41 }
 0x195   : > { %v1048_v49 = vpop.f32.mrb[84].mxu0  ;;  %v1337_v50 = vpop.f32.mrb[84].mxu1 }
 0x196   : > { %1464 = vst [vmem:[%s2515_s6 + $0x70] sm:$0xff] %v1439_v44  ;;  %v1440_v51 = vmax.f32 %v2469_v24, %v1415_v46  ;;  %v1049_v20 = vadd.f32 %v2405_v58, %v1048_v49  ;;  %v1338_v52 = vadd.f32 %v2405_v58, %v1337_v50  ;;  %v1964_v53 = vpop.f32.mrb[85].mxu0  ;;  %v2026_v55 = vpop.f32.mrb[85].mxu1 }
 0x197   : > { %v1051_v23 = vpop.f32.mrb[86].mxu0  ;;  %v1340_v56 = vpop.f32.mrb[86].mxu1 }
 0x198   : > { %1465 = vst [vmem:[%s2515_s6 + $0x78] sm:$0xff] %v1440_v51  ;;  %v1102_v59 = vmax.f32 %v1049_v20, 0.0  ;;  %v1391_v60 = vmax.f32 %v1338_v52, 0.0  ;;  %v1052_v19 = vadd.f32 %v2405_v58, %v1051_v23  ;;  %v1341_v45 = vadd.f32 %v2405_v58, %v1340_v56  ;;  %v1965_v62 = vpop.f32.mrb[87].mxu0  ;;  %v2027_v63 = vpop.f32.mrb[87].mxu1 }
 0x19a   : > { %v1416_v24 = vmax.f32 %v1102_v59, %v1391_v60  ;;  %v1103_v9 = vmax.f32 %v1052_v19, 0.0  ;;  %v1392_v48 = vmax.f32 %v1341_v45, 0.0 }
 0x19c   : > { %v1441_v2 = vmax.f32 %v2475_v42, %v1416_v24  ;;  %v1417_v5 = vmax.f32 %v1103_v9, %v1392_v48 }
 0x19d   : > { %v1056_v6 = vpop.f32.mrb[88].mxu0  ;;  %v1345_v12 = vpop.f32.mrb[88].mxu1 }
 0x19e   : > { %1466 = vst [vmem:[%s2515_s6 + $0x80] sm:$0xff] %v1441_v2  ;;  %v1442_v8 = vmax.f32 %v2477_v47, %v1417_v5  ;;  %v1057_v10 = vadd.f32 %v2405_v58, %v1056_v6  ;;  %v1346_v11 = vadd.f32 %v2405_v58, %v1345_v12  ;;  %v1968_v40 = vpop.f32.mrb[89].mxu0  ;;  %v2030_v13 = vpop.f32.mrb[89].mxu1 }
 0x19f   : > { %v1059_v14 = vpop.f32.mrb[90].mxu0  ;;  %v1348_v16 = vpop.f32.mrb[90].mxu1 }
 0x1a0   : > { %1467 = vst [vmem:[%s2515_s6 + $0x88] sm:$0xff] %v1442_v8  ;;  %v1104_v43 = vmax.f32 %v1057_v10, 0.0  ;;  %v1393_v17 = vmax.f32 %v1346_v11, 0.0  ;;  %v1060_v42 = vadd.f32 %v2405_v58, %v1059_v14  ;;  %v1349_v18 = vadd.f32 %v2405_v58, %v1348_v16  ;;  %v1969_v21 = vpop.f32.mrb[91].mxu0  ;;  %v2031_v22 = vpop.f32.mrb[91].mxu1 }
 0x1a2   : > { %v1418_v47 = vmax.f32 %v1104_v43, %v1393_v17  ;;  %v1105_v25 = vmax.f32 %v1060_v42, 0.0  ;;  %v1394_v0 = vmax.f32 %v1349_v18, 0.0 }
 0x1a4   : > { %v1443_v26 = vmax.f32 %v2483_v4, %v1418_v47  ;;  %v1419_v28 = vmax.f32 %v1105_v25, %v1394_v0 }
 0x1a5   : > { %v1064_v31 = vpop.f32.mrb[92].mxu0  ;;  %v1353_v3 = vpop.f32.mrb[92].mxu1 }
 0x1a6   : > { %1468 = vst [vmem:[%s2515_s6 + $0x90] sm:$0xff] %v1443_v26  ;;  %v1444_v32 = vmax.f32 %v2485_v7, %v1419_v28  ;;  %v1065_v27 = vadd.f32 %v2405_v58, %v1064_v31  ;;  %v1354_v34 = vadd.f32 %v2405_v58, %v1353_v3  ;;  %v1972_v35 = vpop.f32.mrb[93].mxu0  ;;  %v2034_v36 = vpop.f32.mrb[93].mxu1 }
 0x1a7   : > { %v1067_v61 = vpop.f32.mrb[94].mxu0  ;;  %v1356_v30 = vpop.f32.mrb[94].mxu1 }
 0x1a8   : > { %1469 = vst [vmem:[%s2515_s6 + $0x98] sm:$0xff] %v1444_v32  ;;  %v1106_v37 = vmax.f32 %v1065_v27, 0.0  ;;  %v1395_v38 = vmax.f32 %v1354_v34, 0.0  ;;  %v1068_v4 = vadd.f32 %v2405_v58, %v1067_v61  ;;  %v1357_v1 = vadd.f32 %v2405_v58, %v1356_v30  ;;  %v1973_v39 = vpop.f32.mrb[95].mxu0  ;;  %v2035_v41 = vpop.f32.mrb[95].mxu1 }
 0x1aa   : > { %v1420_v7 = vmax.f32 %v1106_v37, %v1395_v38  ;;  %v1107_v44 = vmax.f32 %v1068_v4, 0.0  ;;  %v1396_v46 = vmax.f32 %v1357_v1, 0.0 }
 0x1ac   : > { %v1445_v49 = vmax.f32 %v2491_v29, %v1420_v7  ;;  %v1421_v50 = vmax.f32 %v1107_v44, %v1396_v46 }
 0x1ad   : > { %v1072_v51 = vpop.f32.mrb[96].mxu0  ;;  %v1361_v20 = vpop.f32.mrb[96].mxu1 }
 0x1ae   : > { %1470 = vst [vmem:[%s2515_s6 + $0xa0] sm:$0xff] %v1445_v49  ;;  %v1446_v52 = vmax.f32 %v2493_v33, %v1421_v50  ;;  %v1073_v53 = vadd.f32 %v2405_v58, %v1072_v51  ;;  %v1362_v55 = vadd.f32 %v2405_v58, %v1361_v20  ;;  %v1976_v23 = vpop.f32.mrb[97].mxu0  ;;  %v2038_v56 = vpop.f32.mrb[97].mxu1 }
 0x1af   : > { %v1075_v59 = vpop.f32.mrb[98].mxu0  ;;  %v1364_v60 = vpop.f32.mrb[98].mxu1 }
 0x1b0   : > { %1471 = vst [vmem:[%s2515_s6 + $0xa8] sm:$0xff] %v1446_v52  ;;  %v1108_v19 = vmax.f32 %v1073_v53, 0.0  ;;  %v1397_v45 = vmax.f32 %v1362_v55, 0.0  ;;  %v1076_v29 = vadd.f32 %v2405_v58, %v1075_v59  ;;  %v1365_v62 = vadd.f32 %v2405_v58, %v1364_v60  ;;  %v1977_v63 = vpop.f32.mrb[99].mxu0  ;;  %v2039_v24 = vpop.f32.mrb[99].mxu1 }
 0x1b2   : > { %v1422_v33 = vmax.f32 %v1108_v19, %v1397_v45  ;;  %v1109_v9 = vmax.f32 %v1076_v29, 0.0  ;;  %v1398_v48 = vmax.f32 %v1365_v62, 0.0 }
 0x1b4   : > { %v1447_v2 = vmax.f32 %v2499_v54, %v1422_v33  ;;  %v1423_v5 = vmax.f32 %v1109_v9, %v1398_v48 }
 0x1b5   : > { %v1080_v6 = vpop.f32.mrb[100].mxu0  ;;  %v1369_v12 = vpop.f32.mrb[100].mxu1 }
 0x1b6   : > { %1472 = vst [vmem:[%s2515_s6 + $0xb0] sm:$0xff] %v1447_v2  ;;  %v1448_v8 = vmax.f32 %v2501_v57, %v1423_v5  ;;  %v1081_v10 = vadd.f32 %v2405_v58, %v1080_v6  ;;  %v1370_v11 = vadd.f32 %v2405_v58, %v1369_v12  ;;  %v1980_v40 = vpop.f32.mrb[101].mxu0  ;;  %v2042_v13 = vpop.f32.mrb[101].mxu1 }
 0x1b7   : > { %v1083_v14 = vpop.f32.mrb[102].mxu0  ;;  %v1372_v16 = vpop.f32.mrb[102].mxu1 }
 0x1b8   : > { %1473 = vst [vmem:[%s2515_s6 + $0xb8] sm:$0xff] %v1448_v8  ;;  %v1110_v43 = vmax.f32 %v1081_v10, 0.0  ;;  %v1399_v17 = vmax.f32 %v1370_v11, 0.0  ;;  %v1981_v42 = vpop.f32.mrb[103].mxu0  ;;  %v2043_v54 = vpop.f32.mrb[103].mxu1 }
 0x1ba   : > { %v1424_v18 = vmax.f32 %v1110_v43, %v1399_v17 }
 0x1bc   : > { %v1449_v21 = vmax.f32 %v2505_v15, %v1424_v18 }
 0x1be   : > { %1474 = vst [vmem:[%s2515_s6 + $0xc0] sm:$0xf] %v1449_v21 }
 0x1bf PF: > { %s13_s12 = sadd.s32 1, %s2119_s12  }
 0x1c0   : > { %p10_p4 = scmp.ge.s32.totalorder %s13_s12, 4  }
 0x1c2   :  { %12 = sbr.rel (!%p10_p4) target bundleno = 1 (0x1), region = 65 }

// kernel: cnn_cifar_forward.4
= control target key start
LH: loop header
LB: loop body
LE: loop exit
PB: predicated region body
PF: predicated region fallthrough
CT: control target
= control target key end

     0   :  { %s790_s12 = smov 0   ;;  %s976_s0 = inlined_call_operand.vmem [shape: bf16[2,4,25,152], index: 0, kind: input, shape index: {}]   ;;  %s977_s1 = inlined_call_operand.vmem [shape: bf16[152,128], index: 1, kind: input, shape index: {}]   ;;  %s978_s2 = inlined_call_operand.vmem [shape: f32[1,128], index: 2, kind: input, shape index: {}]   ;;  %s979_s3 = inlined_call_operand.vmem [shape: f32[2,25,128], index: 3, kind: output, shape index: {}]  }
   0x1 LB: > { %s658_s13 = sadd.s32 4294967295, %s767_s12   ;;  %p662_p0 = scmp.ge.s32.totalorder %s767_s12, 1  ;;  %s767_s12 = sphi %s790_s12, %s13_s12  }
   0x2   : > { %p137_p1 = scmp.lt.s32.totalorder %s767_s12, 3 }
   0x4   : > { %p138_p2 = pnand %p662_p0, %p137_p1 }
   0x5   : > { %v801_v0 = vld [vmem:[%s977_s1] sm:$0xff] (!%p138_p2)   ;;  %v769_v1 = vmov (!%p138_p2), 0   ;;  %v810_v2 = vld [vmem:[%s977_s1 + $0x8] sm:$0xff] (!%p138_p2)   ;;  %p161_p3 = scmp.lt.s32.totalorder (!%p138_p2), %s658_s13, 1  ;;  %v821_v3 = vld [vmem:[%s977_s1 + $0x10] sm:$0xff] (!%p138_p2)   ;;  %vm277_vm0 = vcmask (!%p138_p2), 195584  }
   0x6   : > { %141 = sbr.rel (%p138_p2) target bundleno = 317 (0x13d), region = 32  ;;  %288 = vmatprep.subr.bf16.mxu0 (!%p138_p2), %v769_v1  ;;  %370 = vmatprep.subr.bf16.mxu1 (!%p138_p2), %v769_v1  ;;  %v836_v4 = vld [vmem:[%s977_s1 + $0x18] sm:$0xff] (!%p138_p2)   ;;  %v848_v7 = vld [vmem:[%s977_s1 + $0x20] sm:$0xff] (!%p138_p2)   ;;  %v858_v8 = vld [vmem:[%s977_s1 + $0x28] sm:$0xff] (!%p138_p2)   ;;  %vm284_vm1 = vcmask (!%p138_p2), 1043456  }
   0x7   : > { %289 = vmatpush1.bf16.msra.mxu0 (!%p138_p2), %v801_v0  ;;  %371 = vmatpush1.bf16.msra.mxu1 (!%p138_p2), %v801_v0  ;;  %v867_v9 = vld [vmem:[%s977_s1 + $0x30] sm:$0xff] (!%p138_p2)   ;;  %v876_v10 = vld [vmem:[%s977_s1 + $0x38] sm:$0xff] (!%p138_p2)   ;;  %v735_v11 = vld [vmem:[%s977_s1 + $0x40] sm:$0xff] (!%p138_p2)  }
   0x8   : > { %290 = vmatprep.subr.bf16.mxu0 (!%p138_p2), %v769_v1  ;;  %372 = vmatprep.subr.bf16.mxu1 (!%p138_p2), %v769_v1  ;;  %v736_v12 = vld [vmem:[%s977_s1 + $0x48] ss:$0 sps:$4 sm:$0xff] (!%p138_p2)   ;;  %v951_v28 = vld [vmem:[%s978_s2] ss:$0 sm:$0xff] (!%p138_p2) }
   0x9   : > { %v286_v13 = vsel (!%p138_p2), %vm284_vm1, %v736_v12, 0 }
   0xb   : > { %291 = vmatpush1.bf16.msra.mxu0 (!%p138_p2), %v810_v2  ;;  %373 = vmatpush1.bf16.msra.mxu1 (!%p138_p2), %v810_v2 }
   0xc   : > { %292 = vmatprep.subr.bf16.mxu0 (!%p138_p2), %v769_v1  ;;  %374 = vmatprep.subr.bf16.mxu1 (!%p138_p2), %v769_v1 }
   0xd   : > { %s981_s13 = smov (!%p161_p3, %s658_s13), 1 }
   0xe   : > { %s716_s20 = sshll.u32 %s981_s13, 7  ;;  %s717_s15 = sshll.u32 %s981_s13, 5 }
   0xf   : > { %s829_s23 = scalar_lea.vmem %s976_s0, %s716_s20  ;;  %293 = vmatpush1.bf16.msra.mxu0 %v821_v3  ;;  %375 = vmatpush1.bf16.msra.mxu1 %v821_v3  ;;  %s170_s18 = scalar_lea.vmem %s979_s3, %s717_s15 }
  0x10   : > { %v739_v5 = vld [vmem:[%s829_s23 + $0x4] ss:$8 sps:$4 sm:$0xff]   ;;  %294 = vmatprep.subr.bf16.mxu0 %v769_v1  ;;  %376 = vmatprep.subr.bf16.mxu1 %v769_v1  ;;  %v737_v14 = vld [vmem:[%s829_s23] ss:$8 sps:$4 sm:$0xff]  }
  0x11   : > { %682 = vmatprep.mubr.msk.bf16.mxu0 %vm277_vm0, %v739_v5  ;;  %v742_v6 = vld [vmem:[%s829_s23 + $0x24] ss:$8 sps:$4 sm:$0xff]   ;;  %v740_v15 = vld [vmem:[%s829_s23 + $0x20] ss:$8 sps:$4 sm:$0xff]  }
  0x12   : > { %692 = vmatprep.mubr.msk.bf16.mxu1 %vm277_vm0, %v742_v6  ;;  %v743_v16 = vld [vmem:[%s829_s23 + $0x14] ss:$8 sps:$4 sm:$0x1f]   ;;  %v747_v18 = vld [vmem:[%s829_s23 + $0x10] ss:$8 sps:$4 sm:$0x1f]  }
  0x13   : > { %295 = vmatpush1.bf16.msra.mxu0 %v836_v4  ;;  %377 = vmatpush1.bf16.msra.mxu1 %v836_v4  ;;  %v745_v17 = vld [vmem:[%s829_s23 + $0x34] ss:$8 sps:$4 sm:$0x1f]   ;;  %v748_v19 = vld [vmem:[%s829_s23 + $0x30] ss:$8 sps:$4 sm:$0x1f]  }
  0x14   : > { %296 = vmatprep.subr.bf16.mxu0 %v769_v1  ;;  %378 = vmatprep.subr.bf16.mxu1 %v769_v1  ;;  %v751_v20 = vld [vmem:[%s829_s23 + $0x44] ss:$8 sps:$4 sm:$0xff]   ;;  %v749_v22 = vld [vmem:[%s829_s23 + $0x40] ss:$8 sps:$4 sm:$0xff]  }
  0x15   : > { %v754_v21 = vld [vmem:[%s829_s23 + $0x64] ss:$8 sps:$4 sm:$0xff]   ;;  %v752_v23 = vld [vmem:[%s829_s23 + $0x60] ss:$8 sps:$4 sm:$0xff]  }
  0x16   : > { %v755_v24 = vld [vmem:[%s829_s23 + $0x54] ss:$8 sps:$4 sm:$0x1f]   ;;  %v759_v26 = vld [vmem:[%s829_s23 + $0x50] ss:$8 sps:$4 sm:$0x1f]  }
  0x17   : > { %297 = vmatpush1.bf16.msra.mxu0 %v848_v7  ;;  %379 = vmatpush1.bf16.msra.mxu1 %v848_v7  ;;  %v757_v25 = vld [vmem:[%s829_s23 + $0x74] ss:$8 sps:$4 sm:$0x1f]   ;;  %v760_v27 = vld [vmem:[%s829_s23 + $0x70] ss:$8 sps:$4 sm:$0x1f]  }
  0x18   : > { %298 = vmatprep.subr.bf16.mxu0 %v769_v1  ;;  %380 = vmatprep.subr.bf16.mxu1 %v769_v1 }
  0x1b   : > { %299 = vmatpush1.bf16.msra.mxu0 %v858_v8  ;;  %381 = vmatpush1.bf16.msra.mxu1 %v858_v8 }
  0x1c   : > { %300 = vmatprep.subr.bf16.mxu0 %v769_v1  ;;  %382 = vmatprep.subr.bf16.mxu1 %v769_v1 }
  0x1f   : > { %301 = vmatpush1.bf16.msra.mxu0 %v867_v9  ;;  %383 = vmatpush1.bf16.msra.mxu1 %v867_v9 }
  0x20   : > { %302 = vmatprep.subr.bf16.mxu0 %v769_v1  ;;  %384 = vmatprep.subr.bf16.mxu1 %v769_v1 }
  0x23   : > { %303 = vmatpush1.bf16.msra.mxu0 %v876_v10  ;;  %385 = vmatpush1.bf16.msra.mxu1 %v876_v10 }
  0x24   : > { %304 = vmatprep.subr.bf16.mxu0 %v769_v1  ;;  %386 = vmatprep.subr.bf16.mxu1 %v769_v1 }
  0x27   : > { %305 = vmatpush1.bf16.msra.mxu0 %v735_v11  ;;  %387 = vmatpush1.bf16.msra.mxu1 %v735_v11 }
  0x28   : > { %306 = vmatprep.subr.bf16.mxu0 %v769_v1  ;;  %388 = vmatprep.subr.bf16.mxu1 %v769_v1 }
  0x2b   : > { %307 = vmatpush1.bf16.msra.mxu0 %v286_v13  ;;  %389 = vmatpush1.bf16.msra.mxu1 %v286_v13 }
  0x2c   : > { %456 = vmatprep.subr.bf16.mxu0 %v769_v1  ;;  %538 = vmatprep.subr.bf16.mxu1 %v769_v1 }
  0x2e   : > { %321 = vmatmul.mubr.bf16.vlgmr.msra.gmra.mrb[0].mxu0 %v737_v14  ;;  %403 = vmatmul.mubr.bf16.vlgmr.msra.gmra.mrb[0].mxu1 %v740_v15 }
  0x2f   : > { %457 = vmatpush1.bf16.msra.mxu0 %v801_v0  ;;  %539 = vmatpush1.bf16.msra.mxu1 %v801_v0 }
  0x30   : > { %458 = vmatprep.subr.bf16.mxu0 %v769_v1  ;;  %540 = vmatprep.subr.bf16.mxu1 %v769_v1 }
  0x31   : > { %683 = vmatprep.mubr.msk.bf16.mxu0 %vm277_vm0, %v743_v16  ;;  %693 = vmatprep.mubr.msk.bf16.mxu1 %vm277_vm0, %v745_v17 }
  0x33   : > { %459 = vmatpush1.bf16.msra.mxu0 %v810_v2  ;;  %541 = vmatpush1.bf16.msra.mxu1 %v810_v2 }
  0x34   : > { %460 = vmatprep.subr.bf16.mxu0 %v769_v1  ;;  %542 = vmatprep.subr.bf16.mxu1 %v769_v1 }
  0x36   : > { %329 = vmatmul.mubr.bf16.gmra.mrb[4].mxu0 %v747_v18  ;;  %411 = vmatmul.mubr.bf16.gmra.mrb[4].mxu1 %v748_v19 }
  0x37   : > { %461 = vmatpush1.bf16.msra.mxu0 %v821_v3  ;;  %543 = vmatpush1.bf16.msra.mxu1 %v821_v3 }
  0x38   : > { %462 = vmatprep.subr.bf16.mxu0 %v769_v1  ;;  %544 = vmatprep.subr.bf16.mxu1 %v769_v1 }
  0x39   : > { %702 = vmatprep.mubr.msk.bf16.mxu0 %vm277_vm0, %v751_v20  ;;  %712 = vmatprep.mubr.msk.bf16.mxu1 %vm277_vm0, %v754_v21 }
  0x3b   : > { %463 = vmatpush1.bf16.msra.mxu0 %v836_v4  ;;  %545 = vmatpush1.bf16.msra.mxu1 %v836_v4 }
  0x3c   : > { %464 = vmatprep.subr.bf16.mxu0 %v769_v1  ;;  %546 = vmatprep.subr.bf16.mxu1 %v769_v1 }
  0x3f   : > { %465 = vmatpush1.bf16.msra.mxu0 %v848_v7  ;;  %547 = vmatpush1.bf16.msra.mxu1 %v848_v7 }
  0x40   : > { %466 = vmatprep.subr.bf16.mxu0 %v769_v1  ;;  %548 = vmatprep.subr.bf16.mxu1 %v769_v1 }
  0x43   : > { %467 = vmatpush1.bf16.msra.mxu0 %v858_v8  ;;  %549 = vmatpush1.bf16.msra.mxu1 %v858_v8 }
  0x44   : > { %468 = vmatprep.subr.bf16.mxu0 %v769_v1  ;;  %550 = vmatprep.subr.bf16.mxu1 %v769_v1 }
  0x47   : > { %469 = vmatpush1.bf16.msra.mxu0 %v867_v9  ;;  %551 = vmatpush1.bf16.msra.mxu1 %v867_v9 }
  0x48   : > { %470 = vmatprep.subr.bf16.mxu0 %v769_v1  ;;  %552 = vmatprep.subr.bf16.mxu1 %v769_v1 }
  0x4b   : > { %471 = vmatpush1.bf16.msra.mxu0 %v876_v10  ;;  %553 = vmatpush1.bf16.msra.mxu1 %v876_v10 }
  0x4c   : > { %472 = vmatprep.subr.bf16.mxu0 %v769_v1  ;;  %554 = vmatprep.subr.bf16.mxu1 %v769_v1 }
  0x4f   : > { %473 = vmatpush1.bf16.msra.mxu0 %v735_v11  ;;  %555 = vmatpush1.bf16.msra.mxu1 %v735_v11 }
  0x50   : > { %474 = vmatprep.subr.bf16.mxu0 %v769_v1  ;;  %556 = vmatprep.subr.bf16.mxu1 %v769_v1 }
  0x53   : > { %475 = vmatpush1.bf16.msra.mxu0 %v286_v13  ;;  %557 = vmatpush1.bf16.msra.mxu1 %v286_v13 }
  0x56   : > { %489 = vmatmul.mubr.bf16.vlgmr.msra.gmra.mrb[8].mxu0 %v749_v22  ;;  %571 = vmatmul.mubr.bf16.vlgmr.msra.gmra.mrb[8].mxu1 %v752_v23 }
  0x57   : > { %703 = vmatprep.mubr.msk.bf16.mxu0 %vm277_vm0, %v755_v24  ;;  %713 = vmatprep.mubr.msk.bf16.mxu1 %vm277_vm0, %v757_v25 }
  0x5e   : > { %497 = vmatmul.mubr.bf16.gmra.mrb[12].mxu0 %v759_v26  ;;  %579 = vmatmul.mubr.bf16.gmra.mrb[12].mxu1 %v760_v27 }
 0x101   : > { %v322_v29 = vpop.f32.mrb[0].mxu0  ;;  %v404_v30 = vpop.f32.mrb[0].mxu1 }
 0x102   : > { %v323_v31 = vadd.f32 %v951_v28, %v322_v29  ;;  %v405_v32 = vadd.f32 %v951_v28, %v404_v30  ;;  %v324_v33 = vpop.f32.mrb[1].mxu0  ;;  %v406_v34 = vpop.f32.mrb[1].mxu1 }
 0x103   : > { %v325_v35 = vpop.f32.mrb[2].mxu0  ;;  %v407_v36 = vpop.f32.mrb[2].mxu1 }
 0x104   : > { %v337_v37 = vmax.f32 %v323_v31, 0.0  ;;  %v419_v38 = vmax.f32 %v405_v32, 0.0  ;;  %v326_v39 = vadd.f32 %v951_v28, %v325_v35  ;;  %v408_v40 = vadd.f32 %v951_v28, %v407_v36  ;;  %v327_v41 = vpop.f32.mrb[3].mxu0  ;;  %v409_v42 = vpop.f32.mrb[3].mxu1 }
 0x106   : > { %v423_v43 = vmax.f32 %v337_v37, %v419_v38  ;;  %v338_v44 = vmax.f32 %v326_v39, 0.0  ;;  %v420_v45 = vmax.f32 %v408_v40, 0.0 }
 0x108   : > { %v424_v46 = vmax.f32 %v338_v44, %v420_v45 }
 0x109   : > { %v330_v47 = vpop.f32.mrb[4].mxu0  ;;  %v412_v48 = vpop.f32.mrb[4].mxu1 }
 0x10a   : > { %v331_v49 = vadd.f32 %v951_v28, %v330_v47  ;;  %v413_v50 = vadd.f32 %v951_v28, %v412_v48  ;;  %v332_v51 = vpop.f32.mrb[5].mxu0  ;;  %v414_v52 = vpop.f32.mrb[5].mxu1 }
 0x10b   : > { %v333_v53 = vpop.f32.mrb[6].mxu0  ;;  %v415_v54 = vpop.f32.mrb[6].mxu1 }
 0x10c   : > { %v339_v55 = vmax.f32 %v331_v49, 0.0  ;;  %v421_v56 = vmax.f32 %v413_v50, 0.0  ;;  %v334_v57 = vadd.f32 %v951_v28, %v333_v53  ;;  %v416_v58 = vadd.f32 %v951_v28, %v415_v54  ;;  %v335_v59 = vpop.f32.mrb[7].mxu0  ;;  %v417_v60 = vpop.f32.mrb[7].mxu1 }
 0x10e   : > { %v425_v61 = vmax.f32 %v339_v55, %v421_v56  ;;  %v340_v62 = vmax.f32 %v334_v57, 0.0  ;;  %v422_v63 = vmax.f32 %v416_v58, 0.0 }
 0x110   : > { %v426_v0 = vmax.f32 %v340_v62, %v422_v63 }
 0x129   : > { %v490_v1 = vpop.f32.mrb[8].mxu0  ;;  %v572_v2 = vpop.f32.mrb[8].mxu1 }
 0x12a   : > { %v491_v3 = vadd.f32 %v951_v28, %v490_v1  ;;  %v573_v4 = vadd.f32 %v951_v28, %v572_v2  ;;  %v492_v5 = vpop.f32.mrb[9].mxu0  ;;  %v574_v6 = vpop.f32.mrb[9].mxu1 }
 0x12b   : > { %v493_v7 = vpop.f32.mrb[10].mxu0  ;;  %v575_v8 = vpop.f32.mrb[10].mxu1 }
 0x12c   : > { %v505_v9 = vmax.f32 %v491_v3, 0.0  ;;  %v587_v10 = vmax.f32 %v573_v4, 0.0  ;;  %v494_v11 = vadd.f32 %v951_v28, %v493_v7  ;;  %v576_v12 = vadd.f32 %v951_v28, %v575_v8  ;;  %v495_v13 = vpop.f32.mrb[11].mxu0  ;;  %v577_v14 = vpop.f32.mrb[11].mxu1 }
 0x12e   : > { %v591_v15 = vmax.f32 %v505_v9, %v587_v10  ;;  %v506_v16 = vmax.f32 %v494_v11, 0.0  ;;  %v588_v17 = vmax.f32 %v576_v12, 0.0 }
 0x130   : > { %v595_v18 = vmax.f32 %v423_v43, %v591_v15  ;;  %v592_v19 = vmax.f32 %v506_v16, %v588_v17 }
 0x131   : > { %v498_v20 = vpop.f32.mrb[12].mxu0  ;;  %v580_v21 = vpop.f32.mrb[12].mxu1 }
 0x132   : > { %599 = vst [vmem:[%s170_s18] sm:$0xff] %v595_v18  ;;  %v596_v22 = vmax.f32 %v424_v46, %v592_v19  ;;  %v499_v23 = vadd.f32 %v951_v28, %v498_v20  ;;  %v581_v24 = vadd.f32 %v951_v28, %v580_v21  ;;  %v500_v25 = vpop.f32.mrb[13].mxu0  ;;  %v582_v26 = vpop.f32.mrb[13].mxu1 }
 0x133   : > { %v501_v27 = vpop.f32.mrb[14].mxu0  ;;  %v583_v29 = vpop.f32.mrb[14].mxu1 }
 0x134   : > { %600 = vst [vmem:[%s170_s18 + $0x8] sm:$0xff] %v596_v22  ;;  %v507_v30 = vmax.f32 %v499_v23, 0.0  ;;  %v589_v31 = vmax.f32 %v581_v24, 0.0  ;;  %v502_v32 = vadd.f32 %v951_v28, %v501_v27  ;;  %v584_v33 = vadd.f32 %v951_v28, %v583_v29  ;;  %v503_v34 = vpop.f32.mrb[15].mxu0  ;;  %v585_v35 = vpop.f32.mrb[15].mxu1 }
 0x136   : > { %v593_v36 = vmax.f32 %v507_v30, %v589_v31  ;;  %v508_v37 = vmax.f32 %v502_v32, 0.0  ;;  %v590_v38 = vmax.f32 %v584_v33, 0.0 }
 0x138   : > { %v597_v39 = vmax.f32 %v425_v61, %v593_v36  ;;  %v594_v40 = vmax.f32 %v508_v37, %v590_v38 }
 0x13a   : > { %601 = vst [vmem:[%s170_s18 + $0x10] sm:$0xff] %v597_v39  ;;  %v598_v41 = vmax.f32 %v426_v0, %v594_v40 }
 0x13c   : > { %602 = vst [vmem:[%s170_s18 + $0x18] sm:$0x1] %v598_v41 }
 0x13d PF: > { %s13_s12 = sadd.s32 1, %s767_s12  }
 0x13e   : > { %p10_p4 = scmp.ge.s32.totalorder %s13_s12, 4  }
 0x140   :  { %12 = sbr.rel (!%p10_p4) target bundleno = 1 (0x1), region = 65 }

// kernel: cnn_cifar_forward.5
= control target key start
LH: loop header
LB: loop body
LE: loop exit
PB: predicated region body
PF: predicated region fallthrough
CT: control target
= control target key end

     0   :  { %v785_v1 = vmov 0   ;;  %v98_v20 = vlaneseq  ;;  %v786_v25 = vmov 1966171168   ;;  %vm264_vm0 = vcmask 130048   ;;  %s1004_s0 = inlined_call_operand.vmem [shape: bf16[2,400], index: 0, kind: input, shape index: {}]   ;;  %s1005_s1 = inlined_call_operand.vmem [shape: bf16[400,128], index: 1, kind: input, shape index: {}]   ;;  %s1006_s2 = inlined_call_operand.vmem [shape: f32[1,128], index: 2, kind: input, shape index: {}]   ;;  %s1007_s3 = inlined_call_operand.vmem [shape: bf16[128,128], index: 3, kind: input, shape index: {}]   ;;  %s1008_s4 = inlined_call_operand.vmem [shape: f32[1,128], index: 4, kind: input, shape index: {}]   ;;  %s1009_s5 = inlined_call_operand.vmem [shape: bf16[128,128], index: 5, kind: input, shape index: {}]   ;;  %s1010_s6 = inlined_call_operand.vmem [shape: f32[1,128], index: 6, kind: input, shape index: {}]   ;;  %s1011_s7 = inlined_call_operand.hbm [shape: f32[2,128], index: 7, kind: output, shape index: {}]  }
   0x1   :  { %v720_v0 = vld [vmem:[%s1005_s1 + $0x40] sm:$0xff]   ;;  %308 = vmatprep.subr.bf16.mxu1 %v785_v1  ;;  %v723_v4 = vld [vmem:[%s1005_s1 + $0x48] sm:$0xff]   ;;  %v726_v7 = vld [vmem:[%s1005_s1 + $0x50] sm:$0xff]   ;;  %v96_v26 = vunpack.c.l.s4 %v786_v25  ;;  %v787_v38 = vmov 0.0  }
   0x2   :  { %v721_v2 = vld [vmem:[%s1005_s1 + $0x80] sm:$0xff]   ;;  %635 = vmatprep.subr.bf16.mxu0 %v720_v0  ;;  %v724_v5 = vld [vmem:[%s1005_s1 + $0x88] sm:$0xff]   ;;  %v727_v8 = vld [vmem:[%s1005_s1 + $0x90] sm:$0xff]   ;;  %v99_v27 = vshrl.u32 %v98_v20, 7 }
   0x3   :  { %v722_v3 = vld [vmem:[%s1005_s1] sm:$0xff]   ;;  %309 = vmatpush1.bf16.msra.mxu1 %v721_v2  ;;  %v725_v6 = vld [vmem:[%s1005_s1 + $0x8] sm:$0xff]   ;;  %v728_v9 = vld [vmem:[%s1005_s1 + $0x10] sm:$0xff]   ;;  %v97_v30 = vunpack.c.0.s8 %v96_v26 }
   0x4   :  { %636 = vmatpush3.bf16.msra.mxu0 %v722_v3  ;;  %310 = vmatprep.subr.bf16.mxu1 %v785_v1  ;;  %v729_v10 = vld [vmem:[%s1005_s1 + $0x58] sm:$0xff]   ;;  %v732_v13 = vld [vmem:[%s1005_s1 + $0x60] sm:$0xff]   ;;  %v735_v16 = vld [vmem:[%s1005_s1 + $0x68] sm:$0xff]  }
   0x5   :  { %637 = vmatprep.subr.bf16.mxu0 %v723_v4  ;;  %v730_v11 = vld [vmem:[%s1005_s1 + $0x98] sm:$0xff]   ;;  %v733_v14 = vld [vmem:[%s1005_s1 + $0xa0] sm:$0xff]   ;;  %v736_v17 = vld [vmem:[%s1005_s1 + $0xa8] sm:$0xff]   ;;  %v100_v32 = vsub.s32 %v97_v30, %v99_v27 }
   0x6   :  { %v731_v12 = vld [vmem:[%s1005_s1 + $0x18] sm:$0xff]   ;;  %v734_v15 = vld [vmem:[%s1005_s1 + $0x20] sm:$0xff]   ;;  %v737_v18 = vld [vmem:[%s1005_s1 + $0x28] sm:$0xff]  }
   0x7   :  { %311 = vmatpush1.bf16.msra.mxu1 %v724_v5  ;;  %v738_v19 = vld [vmem:[%s1005_s1 + $0x70] sm:$0xff]   ;;  %v590_v23 = vld.sshfl [vmem:[%s1004_s0] sm:$0x33 pattern:$0x75316420]  ;;  %v741_v24 = vld [vmem:[%s1005_s1 + $0x78] sm:$0xff]  }
   0x8   :  { %638 = vmatpush3.bf16.msra.mxu0 %v725_v6  ;;  %312 = vmatprep.subr.bf16.mxu1 %v785_v1  ;;  %v739_v21 = vld [vmem:[%s1005_s1 + $0xb0] sm:$0xff]   ;;  %v742_v28 = vld [vmem:[%s1005_s1 + $0xb8] sm:$0xff]   ;;  %v94_v29 = vcombine.high %v590_v23, %v590_v23  ;;  %v744_v33 = vld [vmem:[%s1005_s1 + $0xc0] sm:$0xff]   ;;  %v101_v36 = vrot.slane %v590_v23, %v100_v32 }
   0x9   :  { %639 = vmatprep.subr.bf16.mxu0 %v726_v7  ;;  %v740_v22 = vld [vmem:[%s1005_s1 + $0x30] sm:$0xff]   ;;  %v743_v31 = vld [vmem:[%s1005_s1 + $0x38] sm:$0xff]   ;;  %v745_v34 = vld [vmem:[%s1007_s3] sm:$0xff]  }
   0xa   :  { %v108_v35 = vrot.slane %v94_v29, %v100_v32  ;;  %v109_v39 = vcombine.high %v101_v36, %v101_v36  ;;  %v746_v40 = vld [vmem:[%s1007_s3 + $0x8] sm:$0xff]  }
   0xb   :  { %313 = vmatpush1.bf16.msra.mxu1 %v727_v8 }
   0xc   :  { %640 = vmatpush3.bf16.msra.mxu0 %v728_v9  ;;  %314 = vmatprep.subr.bf16.mxu1 %v785_v1  ;;  %v110_v37 = vcombine.high %v108_v35, %v108_v35 }
   0xd   :  { %641 = vmatprep.subr.bf16.mxu0 %v729_v10  ;;  %300 = vmatprep.mubr.bf16.mxu0 %v108_v35 }
   0xe   :  { %616 = vmatprep.mubr.msk.bf16.mxu1 %vm264_vm0, %v110_v37 }
   0xf   :  { %315 = vmatpush1.bf16.msra.mxu1 %v730_v11 }
  0x10   :  { %642 = vmatpush3.bf16.msra.mxu0 %v731_v12  ;;  %316 = vmatprep.subr.bf16.mxu1 %v785_v1 }
  0x11   :  { %643 = vmatprep.subr.bf16.mxu0 %v732_v13 }
  0x13   :  { %317 = vmatpush1.bf16.msra.mxu1 %v733_v14 }
  0x14   :  { %644 = vmatpush3.bf16.msra.mxu0 %v734_v15  ;;  %318 = vmatprep.subr.bf16.mxu1 %v785_v1 }
  0x15   :  { %645 = vmatprep.subr.bf16.mxu0 %v735_v16 }
  0x17   :  { %319 = vmatpush1.bf16.msra.mxu1 %v736_v17 }
  0x18   :  { %646 = vmatpush3.bf16.msra.mxu0 %v737_v18  ;;  %320 = vmatprep.subr.bf16.mxu1 %v785_v1 }
  0x19   :  { %647 = vmatprep.subr.bf16.mxu0 %v738_v19 }
  0x1b   :  { %321 = vmatpush1.bf16.msra.mxu1 %v739_v21 }
  0x1c   :  { %648 = vmatpush3.bf16.msra.mxu0 %v740_v22  ;;  %322 = vmatprep.subr.bf16.mxu1 %v785_v1 }
  0x1d   :  { %649 = vmatprep.subr.bf16.mxu0 %v741_v24 }
  0x1f   :  { %323 = vmatpush1.bf16.msra.mxu1 %v742_v28 }
  0x20   :  { %650 = vmatpush3.bf16.msra.mxu0 %v743_v31  ;;  %324 = vmatprep.subr.bf16.mxu1 %v785_v1 }
  0x21   :  { %675 = vmatprep.subr.bf16.mxu0 %v787_v38 }
  0x23   :  { %301 = vmatmul.mubr.bf16.vlgmr.msra.gmra.mrb[0].mxu0 %v101_v36  ;;  %325 = vmatpush1.bf16.msra.mxu1 %v744_v33 }
  0x24   :  { %676 = vmatpush3.bf16.msra.mxu0 %v745_v34  ;;  %695 = vmatprep.subr.bf16.mxu1 %v787_v38 }
  0x25   :  { %677 = vmatprep.subr.bf16.mxu0 %v787_v38 }
  0x26   :  { %341 = vmatmul.mubr.bf16.vlgmr.msra.gmra.mrb[0].mxu1 %v109_v39 }
  0x27   :  { %12 = vsyncpa [#allocation3], 0  ;;  %v747_v41 = vld [vmem:[%s1007_s3 + $0x10] sm:$0xff]   ;;  %v748_v42 = vld [vmem:[%s1007_s3 + $0x18] sm:$0xff]   ;;  %vm788_vm1 = vmmov 0   ;;  %s789_s16 = smov [#allocation2]  }
  0x28   :  { %678 = vmatpush3.bf16.msra.mxu0 %v746_v40  ;;  %v749_v43 = vld [vmem:[%s1007_s3 + $0x20] sm:$0xff]   ;;  %v750_v44 = vld [vmem:[%s1007_s3 + $0x28] sm:$0xff]   ;;  %v751_v45 = vld [vmem:[%s1007_s3 + $0x30] sm:$0xff]   ;;  %691 = vmatprep.mubr.msk.bf16.mxu0 %vm788_vm1, %v787_v38  ;;  %s581_s17 = sshll.u32 %s789_s16, 4  ;;  %s582_s17 = int_to_ptr.vmem [resolvable:$true] %s581_s17 }
  0x29   :  { %679 = vmatprep.subr.bf16.mxu0 %v787_v38  ;;  %v752_v46 = vld [vmem:[%s1007_s3 + $0x38] sm:$0xff]   ;;  %711 = vmatprep.mubr.msk.bf16.mxu1 %vm788_vm1, %v787_v38  ;;  %v753_v47 = vld [vmem:[%s1009_s5] sm:$0xff]   ;;  %v754_v48 = vld [vmem:[%s1009_s5 + $0x8] sm:$0xff]   ;;  %p766_p1 = scmp.lt.s32.totalorder %s582_s17, %s582_s17 }
  0x2a   :  { %696 = vmatpush3.bf16.msra.mxu1 %v753_v47  ;;  %v755_v49 = vld [vmem:[%s1009_s5 + $0x10] sm:$0xff]   ;;  %v756_v50 = vld [vmem:[%s1009_s5 + $0x18] sm:$0xff]   ;;  %v757_v51 = vld [vmem:[%s1009_s5 + $0x20] sm:$0xff]  }
  0x2b   :  { %697 = vmatprep.subr.bf16.mxu1 %v787_v38  ;;  %v758_v52 = vld [vmem:[%s1009_s5 + $0x28] sm:$0xff]   ;;  %v589_v55 = vld [vmem:[%s1006_s2] ss:$0 sm:$0xff]  ;;  %v759_v3 = vld [vmem:[%s1009_s5 + $0x30] sm:$0xff]  }
  0x2c   :  { %680 = vmatpush3.bf16.msra.mxu0 %v747_v41  ;;  %v760_v4 = vld [vmem:[%s1009_s5 + $0x38] sm:$0xff]   ;;  %v617_v5 = vld [vmem:[%s1008_s4] ss:$0 sm:$0xff]  ;;  %s761_s4 = scalar_lea.vmem %s582_s17, 32 }
  0x2d   :  { %681 = vmatprep.subr.bf16.mxu0 %v787_v38  ;;  %v626_v13 = vld [vmem:[%s1010_s6] ss:$0 sm:$0xff]  ;;  %p762_p0 = scmp.ne.s32.totalorder %s582_s17, %s761_s4  ;;  %p767_p2 = scmp.lt.s32.totalorder %s761_s4, %s761_s4 }
  0x2e   :  { %698 = vmatpush3.bf16.msra.mxu1 %v754_v48 }
  0x2f   :  { %699 = vmatprep.subr.bf16.mxu1 %v787_v38  ;;  %p768_p3 = por %p767_p2, %p766_p1 }
  0x30   :  { %682 = vmatpush3.bf16.msra.mxu0 %v748_v42 }
  0x31   :  { %683 = vmatprep.subr.bf16.mxu0 %v787_v38  ;;  %p769_p4 = pnand %p768_p3, %p762_p0 }
  0x32   :  { %700 = vmatpush3.bf16.msra.mxu1 %v755_v49 }
  0x33   :  { %701 = vmatprep.subr.bf16.mxu1 %v787_v38 }
  0x34   :  { %684 = vmatpush3.bf16.msra.mxu0 %v749_v43 }
  0x35   :  { %685 = vmatprep.subr.bf16.mxu0 %v787_v38 }
  0x36   :  { %702 = vmatpush3.bf16.msra.mxu1 %v756_v50 }
  0x37   :  { %703 = vmatprep.subr.bf16.mxu1 %v787_v38 }
  0x38   :  { %686 = vmatpush3.bf16.msra.mxu0 %v750_v44 }
  0x39   :  { %687 = vmatprep.subr.bf16.mxu0 %v787_v38 }
  0x3a   :  { %704 = vmatpush3.bf16.msra.mxu1 %v757_v51 }
  0x3b   :  { %705 = vmatprep.subr.bf16.mxu1 %v787_v38 }
  0x3c   :  { %688 = vmatpush3.bf16.msra.mxu0 %v751_v45 }
  0x3d   :  { %689 = vmatprep.subr.bf16.mxu0 %v787_v38 }
  0x3e   :  { %706 = vmatpush3.bf16.msra.mxu1 %v758_v52 }
  0x3f   :  { %707 = vmatprep.subr.bf16.mxu1 %v787_v38 }
  0x40   :  { %690 = vmatpush3.bf16.msra.mxu0 %v752_v46 }
  0x42   :  { %708 = vmatpush3.bf16.msra.mxu1 %v759_v3 }
  0x43   :  { %709 = vmatprep.subr.bf16.mxu1 %v787_v38 }
  0x46   :  { %710 = vmatpush3.bf16.msra.mxu1 %v760_v4 }
  0xf6   :  { %v651_v53 = vpop.f32.mrb[0].mxu0 }
  0xf7   :  { %v652_v54 = vpop.f32.mrb[1].mxu0 }
  0xf8   :  { %v653_v56 = vadd.f32 %v652_v54, %v651_v53  ;;  %v654_v57 = vpop.f32.mrb[2].mxu0 }
  0xf9   :  { %v655_v58 = vpop.f32.mrb[3].mxu0  ;;  %v342_v59 = vpop.f32.mrb[0].mxu1 }
  0xfa   :  { %v303_v60 = vadd.f32 %v653_v56, %v589_v55  ;;  %v344_v61 = vpop.f32.mrb[1].mxu1 }
  0xfb   :  { %v345_v62 = vpop.f32.mrb[2].mxu1 }
  0xfc   :  { %v343_v63 = vadd.f32 %v342_v59, %v303_v60  ;;  %v346_v0 = vpop.f32.mrb[3].mxu1 }
  0xfe   :  { %v348_v1 = vmax.f32 %v343_v63, 0.0 }
 0x100   :  { %v349_v2 = vpack.c.bf16 %v348_v1, %v348_v1 }
 0x102   :  { %692 = vmatmul.mubr.bf16.vlgmr.msra.gmra.mrb[4].mxu0 %v349_v2 }
 0x1d5   :  { %v455_v6 = vpop.f32.mrb[4].mxu0 }
 0x1d6   :  { %v456_v7 = vadd.f32 %v617_v5, %v455_v6  ;;  %v693_v8 = vpop.f32.mrb[5].mxu0 }
 0x1d7   :  { %v458_v9 = vpop.f32.mrb[6].mxu0 }
 0x1d8   :  { %v461_v10 = vmax.f32 %v456_v7, 0.0  ;;  %v694_v11 = vpop.f32.mrb[7].mxu0 }
 0x1da   :  { %v462_v12 = vpack.c.bf16 %v461_v10, %v461_v10 }
 0x1dc   :  { %712 = vmatmul.mubr.bf16.vlgmr.msra.gmra.mrb[4].mxu1 %v462_v12 }
 0x2af   :  { %v568_v14 = vpop.f32.mrb[4].mxu1 }
 0x2b0   :  { %v569_v15 = vadd.f32 %v626_v13, %v568_v14  ;;  %v713_v16 = vpop.f32.mrb[5].mxu1 }
 0x2b1   :  { %v571_v17 = vpop.f32.mrb[6].mxu1 }
 0x2b2   :  { %574 = vst [vmem:[#allocation2] sm:$0x3] %v569_v15  ;;  %v714_v18 = vpop.f32.mrb[7].mxu1 }
 0x2b3   :  { %772 = shalt.err (!%p769_p4)
}
 0x2b4   :  { %s773_s6 = scalar_lea.hbm %s1011_s7, 32 }
 0x2b5   :  { %p774_p5 = scmp.ne.s32.totalorder %s1011_s7, %s773_s6  ;;  %p777_p6 = scmp.lt.u32.totalorder %s773_s6, %s1011_s7 }
 0x2b7   :  { %p779_p7 = pnand %p777_p6, %p774_p5 }
 0x2b9   :  { %782 = shalt.err (!%p779_p7)
}
 0x2ba   :  { %584 = dma.vmem_to_hbm [thread:$0]  %s582_s17, 32, %s1011_s7, [#allocation3]  }
 0x2bb   :  { %783 = dma.done.wait [#allocation3], 32  }
 0x2bc   :  { %784 = vsyncadd [#allocation3], 4294967264 }
 0x2bd   :  { %588 = vsyncpa [#allocation3], 1 }

</bundles_post_ra>
